<compile_context>
chip_gen: v6e
topology: v6e:2x2x1
jax: 0.10.0
libtpu: 0.0.40
codegen_flags: <defaults>
</compile_context>

<pallas_src>
import functools
import math

import jax
import jax.numpy as jnp
from jax.experimental import pallas as pl
from jax.experimental.pallas import tpu as pltpu


# ----------------------------------------------------------------------------
# Fused kernel:  x + dwconv3x3(x)  ->  x + Attn(LN1(x))  ->  x + MLP(LN2(x))
# ----------------------------------------------------------------------------
def _sablock_kernel(x_ref, col_ref, cw_ref, cb_ref, g1_ref, be1_ref,
                    wq_ref, wk_ref, wv_ref, wo_ref, bo_ref,
                    g2_ref, be2_ref, w1_ref, bf1_ref, w2_ref, bf2_ref,
                    o_ref, *, num_heads, H, W, mxu_dtype):
    f32 = jnp.float32
    x = x_ref[0].astype(f32)                    # (N, C) tokens, row-major over (H, W)
    N, C = x.shape

    # ---- pos_embed: depthwise 3x3 conv (padding=1, groups=C) + residual -----
    # Neighbour (i+di, j+dj) of token n = i*W + j is token n + di*W + dj.
    # Sublane rolls (XLU) + boundary masks replace padding and slice taps; the
    # masks also zero the wrap-around rows/cols exactly.
    n_idx = jax.lax.broadcasted_iota(jnp.int32, (N, 1), 0)
    col = col_ref[...]                          # (N, 1) int32 == n % W (precomputed)
    row_ok = {-1: n_idx >= W,                   # row i-1 exists
              0: None,
              1: n_idx < (H - 1) * W}           # row i+1 exists
    col_ok = {-1: col >= 1,                     # column j-1 exists
              0: None,
              1: col < (W - 1)}                 # column j+1 exists

    acc = jnp.zeros((N, C), f32)
    for di in (-1, 0, 1):
        for dj in (-1, 0, 1):
            r_ok, c_ok = row_ok[di], col_ok[dj]
            if r_ok is None:
                ok = c_ok
            elif c_ok is None:
                ok = r_ok
            else:
                ok = jnp.logical_and(r_ok, c_ok)
            dn = di * W + dj
            shifted = x if dn == 0 else pltpu.roll(x, shift=(-dn) % N, axis=0)
            if ok is not None:
                shifted = jnp.where(ok, shifted, 0.0)
            acc = acc + shifted * cw_ref[di + 1, dj + 1, :].astype(f32)
    x = x + acc + cb_ref[0].astype(f32)         # residual 0: x + pos_embed(x)

    def layernorm(v, g_ref, b_ref):
        mu = jnp.mean(v, axis=-1, keepdims=True)
        var = jnp.mean((v - mu) ** 2, axis=-1, keepdims=True)
        return ((v - mu) * jax.lax.rsqrt(var + 1e-5)
                * g_ref[0].astype(f32) + b_ref[0].astype(f32))

    def mm(a, b):                               # MXU operands in mxu_dtype, f32 accum
        return jnp.dot(a.astype(mxu_dtype), b.astype(mxu_dtype),
                       preferred_element_type=f32)

    # ---- residual 1: x + Attention(LN1(x)) ----------------------------------
    xn = layernorm(x, g1_ref, be1_ref)
    attn = jnp.zeros_like(x)
    for h in range(num_heads):                  # heads = pre-split weight slabs
        q = mm(xn, wq_ref[h])                   # (N, hd); softmax scale folded into wq
        k = mm(xn, wk_ref[h])                   # (N, hd)
        v = mm(xn, wv_ref[h])                   # (N, hd)
        s = jax.lax.dot_general(                # q @ k^T without materializing k^T
            q.astype(mxu_dtype), k.astype(mxu_dtype),
            dimension_numbers=(((1,), (1,)), ((), ())),
            preferred_element_type=f32)         # (N, N)
        s = s - jnp.max(s, axis=-1, keepdims=True)
        p = jnp.exp(s)
        p = p * pl.reciprocal(jnp.sum(p, axis=-1, keepdims=True), approx=True)
        attn = attn + mm(mm(p, v), wo_ref[h])   # per-head out-proj, summed (no concat)
    x = x + attn + bo_ref[0].astype(f32)

    # ---- residual 2: x + MLP(LN2(x))  (dropouts are identity in eval mode) --
    x2 = layernorm(x, g2_ref, be2_ref)
    h1 = mm(x2, w1_ref[...]) + bf1_ref[0].astype(f32)
    # exact (erf-based) GELU, matching nn.GELU() default
    h1 = 0.5 * h1 * (1.0 + jax.lax.erf(h1 * (1.0 / math.sqrt(2.0))))
    o_ref[0] = (x + mm(h1, w2_ref[...]) + bf2_ref[0].astype(f32)).astype(o_ref.dtype)


# ----------------------------------------------------------------------------
# Wrapper
# ----------------------------------------------------------------------------
def sablock_forward(x_nchw, params, *, num_heads=2, mxu_dtype=jnp.bfloat16):
    B, C, H, W = x_nchw.shape
    assert C % num_heads == 0
    N = H * W
    hd = C // num_heads
    scale = hd ** (-0.5)

    # NCHW -> (B, N, C) tokens, identical to x.flatten(2).transpose(1, 2).
    tokens = jnp.transpose(x_nchw.reshape(B, C, N), (0, 2, 1))

    # Trace-time (free) weight re-layouts:
    #   * qkv weight split into per-head (num_heads, C, hd) slabs
    #   * softmax scale folded into the q slab
    #   * proj weight split into per-head (num_heads, hd, C) slabs
    wqkv = params["wqkv"]
    split_heads = lambda w: w.reshape(C, num_heads, hd).transpose(1, 0, 2)
    wq = split_heads(wqkv[:, 0:C]) * scale
    wk = split_heads(wqkv[:, C:2 * C])
    wv = split_heads(wqkv[:, 2 * C:3 * C])
    wo = params["wproj"].reshape(num_heads, hd, C)

    # Column index (n % W) of every token, for the conv boundary masks.
    col = (jnp.arange(N, dtype=jnp.int32) % W).reshape(N, 1)

    vec = lambda p: p.reshape(1, C)
    const = lambda shape: pl.BlockSpec(shape, lambda b: (0,) * len(shape))

    out_tokens = pl.pallas_call(
        functools.partial(_sablock_kernel, num_heads=num_heads, H=H, W=W,
                          mxu_dtype=mxu_dtype),
        out_shape=jax.ShapeDtypeStruct((B, N, C), x_nchw.dtype),
        grid=(B,),
        in_specs=[
            pl.BlockSpec((1, N, C), lambda b: (b, 0, 0)),   # tokens (per-batch block)
            const((N, 1)),                                  # token column index
            const((3, 3, C)), const((1, C)),                # depthwise conv w / b
            const((1, C)), const((1, C)),                   # ln1 gamma / beta
            const((num_heads, C, hd)),                      # wq (scale folded in)
            const((num_heads, C, hd)),                      # wk
            const((num_heads, C, hd)),                      # wv
            const((num_heads, hd, C)),                      # per-head proj weight
            const((1, C)),                                  # proj bias
            const((1, C)), const((1, C)),                   # ln2 gamma / beta
            const((C, C)), const((1, C)),                   # fc1 w / b
            const((C, C)), const((1, C)),                   # fc2 w / b
        ],
        out_specs=pl.BlockSpec((1, N, C), lambda b: (b, 0, 0)),
        compiler_params=pltpu.CompilerParams(
            dimension_semantics=("parallel",)),             # batches across TCs
    )(
        tokens, col,
        params["conv_w"], vec(params["conv_b"]),
        vec(params["ln1_g"]), vec(params["ln1_b"]),
        wq, wk, wv, wo, vec(params["bproj"]),
        vec(params["ln2_g"]), vec(params["ln2_b"]),
        params["w_fc1"], vec(params["b_fc1"]),
        params["w_fc2"], vec(params["b_fc2"]),
    )

    # (B, N, C) -> (B, C, H, W)
    return jnp.transpose(out_tokens, (0, 2, 1)).reshape(B, C, H, W)


# ----------------------------------------------------------------------------
# Pure-JAX reference (true-f32 matmuls) for the correctness check
# ----------------------------------------------------------------------------
def _reference(x_nchw, params, *, num_heads=2):
    P = jax.lax.Precision.HIGHEST
    B, C, H, W = x_nchw.shape
    N = H * W
    hd = C // num_heads
    scale = hd ** (-0.5)
    x = jnp.transpose(x_nchw, (0, 2, 3, 1))                 # NHWC
    xp = jnp.pad(x, ((0, 0), (1, 1), (1, 1), (0, 0)))
    conv = jnp.zeros_like(x)
    for ki in range(3):
        for kj in range(3):
            conv = conv + xp[:, ki:ki + H, kj:kj + W, :] * params["conv_w"][ki, kj, :]
    conv = conv + params["conv_b"]
    t = (x + conv).reshape(B, N, C)

    def ln(v, g, b):
        mu = jnp.mean(v, -1, keepdims=True)
        var = jnp.mean((v - mu) ** 2, -1, keepdims=True)
        return (v - mu) / jnp.sqrt(var + 1e-5) * g + b

    xn = ln(t, params["ln1_g"], params["ln1_b"])
    qkv = jnp.einsum("bnc,cd->bnd", xn, params["wqkv"], precision=P)
    outs = []
    for h in range(num_heads):
        q = qkv[..., h * hd:(h + 1) * hd]
        k = qkv[..., C + h * hd:C + (h + 1) * hd]
        v = qkv[..., 2 * C + h * hd:2 * C + (h + 1) * hd]
        s = jnp.einsum("bqd,bkd->bqk", q, k, precision=P) * scale
        p = jax.nn.softmax(s, axis=-1)
        outs.append(jnp.einsum("bqk,bkd->bqd", p, v, precision=P))
    a = jnp.einsum("bnc,cd->bnd", jnp.concatenate(outs, -1),
                   params["wproj"], precision=P) + params["bproj"]
    t = t + a
    xn2 = ln(t, params["ln2_g"], params["ln2_b"])
    h1 = jnp.einsum("bnc,cd->bnd", xn2, params["w_fc1"], precision=P) + params["b_fc1"]
    h1 = 0.5 * h1 * (1.0 + jax.lax.erf(h1 / math.sqrt(2.0)))
    t = t + jnp.einsum("bnc,cd->bnd", h1, params["w_fc2"], precision=P) + params["b_fc2"]
    return jnp.transpose(t.reshape(B, H, W, C), (0, 3, 1, 2))


# ----------------------------------------------------------------------------
# Main
# ----------------------------------------------------------------------------
if __name__ == "__main__":
    B, C, H, W = 2, 8, 8, 8          # dim=8, num_heads=2 -> head_dim=4
    num_heads = 2

    key = jax.random.PRNGKey(0)
    keys = jax.random.split(key, 16)
    x = jax.random.normal(keys[0], (B, C, H, W), jnp.float32)

    # Deterministic synthetic parameters (JAX Linear convention: (in, out)).
    params = {
        "conv_w": 0.1 * jax.random.normal(keys[1], (3, 3, C), jnp.float32),
        "conv_b": 0.1 * jax.random.normal(keys[2], (C,), jnp.float32),
        "ln1_g": 1.0 + 0.05 * jax.random.normal(keys[3], (C,), jnp.float32),
        "ln1_b": 0.05 * jax.random.normal(keys[4], (C,), jnp.float32),
        "wqkv": 0.1 * jax.random.normal(keys[5], (C, 3 * C), jnp.float32),   # qkv_bias=False
        "wproj": 0.1 * jax.random.normal(keys[6], (C, C), jnp.float32),
        "bproj": 0.1 * jax.random.normal(keys[7], (C,), jnp.float32),
        "ln2_g": 1.0 + 0.05 * jax.random.normal(keys[8], (C,), jnp.float32),
        "ln2_b": 0.05 * jax.random.normal(keys[9], (C,), jnp.float32),
        "w_fc1": 0.1 * jax.random.normal(keys[10], (C, C), jnp.float32),
        "b_fc1": 0.1 * jax.random.normal(keys[11], (C,), jnp.float32),
        "w_fc2": 0.1 * jax.random.normal(keys[12], (C, C), jnp.float32),
        "b_fc2": 0.1 * jax.random.normal(keys[13], (C,), jnp.float32),
    }

    out = sablock_forward(x, params, num_heads=num_heads)   # bf16 MXU / f32 accumulation
    out = jax.block_until_ready(out)
    assert out.shape == (B, C, H, W)

    ref = _reference(x, params, num_heads=num_heads)
    max_diff = float(jnp.max(jnp.abs(out - ref)))
    # bf16 MXU operands bound the expected deviation at ~1e-2; genuine layout /
    # indexing regressions show up as O(1e-1) or larger.
    assert max_diff < 3e-2, f"mismatch vs reference: {max_diff}"

    print("KERNEL_OK")
</pallas_src>

<mosaic_0001>
module attributes {stable_mosaic.version = 11 : i64} {
  func.func @_sablock_kernel(%arg0: i32, %arg1: memref<1x64x8xf32, #tpu.memory_space<vmem>>, %arg2: memref<64x1xi32, #tpu.memory_space<vmem>>, %arg3: memref<3x3x8xf32, #tpu.memory_space<vmem>>, %arg4: memref<1x8xf32, #tpu.memory_space<vmem>>, %arg5: memref<1x8xf32, #tpu.memory_space<vmem>>, %arg6: memref<1x8xf32, #tpu.memory_space<vmem>>, %arg7: memref<2x8x4xf32, #tpu.memory_space<vmem>>, %arg8: memref<2x8x4xf32, #tpu.memory_space<vmem>>, %arg9: memref<2x8x4xf32, #tpu.memory_space<vmem>>, %arg10: memref<2x4x8xf32, #tpu.memory_space<vmem>>, %arg11: memref<1x8xf32, #tpu.memory_space<vmem>>, %arg12: memref<1x8xf32, #tpu.memory_space<vmem>>, %arg13: memref<1x8xf32, #tpu.memory_space<vmem>>, %arg14: memref<8x8xf32, #tpu.memory_space<vmem>>, %arg15: memref<1x8xf32, #tpu.memory_space<vmem>>, %arg16: memref<8x8xf32, #tpu.memory_space<vmem>>, %arg17: memref<1x8xf32, #tpu.memory_space<vmem>>, %arg18: memref<1x64x8xf32, #tpu.memory_space<vmem>>) attributes {dimension_semantics = [#tpu.dimension_semantics<parallel>], iteration_bounds = array<i64: 2>, scalar_prefetch = 0 : i64, scratch_operands = 0 : i64, tpu.core_type = #tpu.core_type<tc>, window_params = [{transform_indices = @transform_0, window_bounds = array<i64: 1, 64, 8>}, {pipeline_mode = #tpu.pipeline_mode<synchronous>, transform_indices = @transform_1, window_bounds = array<i64: 64, 1>}, {pipeline_mode = #tpu.pipeline_mode<synchronous>, transform_indices = @transform_2, window_bounds = array<i64: 3, 3, 8>}, {pipeline_mode = #tpu.pipeline_mode<synchronous>, transform_indices = @transform_3, window_bounds = array<i64: 1, 8>}, {pipeline_mode = #tpu.pipeline_mode<synchronous>, transform_indices = @transform_4, window_bounds = array<i64: 1, 8>}, {pipeline_mode = #tpu.pipeline_mode<synchronous>, transform_indices = @transform_5, window_bounds = array<i64: 1, 8>}, {pipeline_mode = #tpu.pipeline_mode<synchronous>, transform_indices = @transform_6, window_bounds = array<i64: 2, 8, 4>}, {pipeline_mode = #tpu.pipeline_mode<synchronous>, transform_indices = @transform_7, window_bounds = array<i64: 2, 8, 4>}, {pipeline_mode = #tpu.pipeline_mode<synchronous>, transform_indices = @transform_8, window_bounds = array<i64: 2, 8, 4>}, {pipeline_mode = #tpu.pipeline_mode<synchronous>, transform_indices = @transform_9, window_bounds = array<i64: 2, 4, 8>}, {pipeline_mode = #tpu.pipeline_mode<synchronous>, transform_indices = @transform_10, window_bounds = array<i64: 1, 8>}, {pipeline_mode = #tpu.pipeline_mode<synchronous>, transform_indices = @transform_11, window_bounds = array<i64: 1, 8>}, {pipeline_mode = #tpu.pipeline_mode<synchronous>, transform_indices = @transform_12, window_bounds = array<i64: 1, 8>}, {pipeline_mode = #tpu.pipeline_mode<synchronous>, transform_indices = @transform_13, window_bounds = array<i64: 8, 8>}, {pipeline_mode = #tpu.pipeline_mode<synchronous>, transform_indices = @transform_14, window_bounds = array<i64: 1, 8>}, {pipeline_mode = #tpu.pipeline_mode<synchronous>, transform_indices = @transform_15, window_bounds = array<i64: 8, 8>}, {pipeline_mode = #tpu.pipeline_mode<synchronous>, transform_indices = @transform_16, window_bounds = array<i64: 1, 8>}, {transform_indices = @transform_17, window_bounds = array<i64: 1, 64, 8>}]} {
    %c0 = arith.constant 0 : index
    %c0_0 = arith.constant 0 : index
    %c0_1 = arith.constant 0 : index
    %0 = vector.load %arg1[%c0, %c0_0, %c0_1] : memref<1x64x8xf32, #tpu.memory_space<vmem>>, vector<1x64x8xf32>
    %1 = vector.shape_cast %0 : vector<1x64x8xf32> to vector<64x8xf32>
    %2 = tpu.iota {dimensions = array<i32: 0>} : vector<64x1xi32>
    %c0_2 = arith.constant 0 : index
    %c0_3 = arith.constant 0 : index
    %3 = vector.load %arg2[%c0_2, %c0_3] : memref<64x1xi32, #tpu.memory_space<vmem>>, vector<64x1xi32>
    %c8_i32 = arith.constant 8 : i32
    %4 = vector.broadcast %c8_i32 : i32 to vector<64x1xi32>
    %5 = arith.cmpi sge, %2, %4 : vector<64x1xi32>
    %c56_i32 = arith.constant 56 : i32
    %6 = vector.broadcast %c56_i32 : i32 to vector<64x1xi32>
    %7 = arith.cmpi slt, %2, %6 : vector<64x1xi32>
    %c1_i32 = arith.constant 1 : i32
    %8 = vector.broadcast %c1_i32 : i32 to vector<64x1xi32>
    %9 = arith.cmpi sge, %3, %8 : vector<64x1xi32>
    %c7_i32 = arith.constant 7 : i32
    %10 = vector.broadcast %c7_i32 : i32 to vector<64x1xi32>
    %11 = arith.cmpi slt, %3, %10 : vector<64x1xi32>
    %cst = arith.constant 0.000000e+00 : f32
    %12 = vector.broadcast %cst : f32 to vector<64x8xf32>
    %13 = arith.andi %5, %9 : vector<64x1xi1>
    %c9_i32 = arith.constant 9 : i32
    %14 = tpu.dynamic_rotate %1 by %c9_i32 dim 0 : vector<64x8xf32>, i32 -> vector<64x8xf32>
    %cst_4 = arith.constant 0.000000e+00 : f32
    %15 = vector.shape_cast %13 : vector<64x1xi1> to vector<64x1xi1>
    %16 = vector.broadcast %15 : vector<64x1xi1> to vector<64x8xi1>
    %17 = vector.broadcast %cst_4 : f32 to vector<64x8xf32>
    %18 = arith.select %16, %14, %17 : vector<64x8xi1>, vector<64x8xf32>
    %c0_5 = arith.constant 0 : index
    %c0_6 = arith.constant 0 : index
    %c0_7 = arith.constant 0 : index
    %19 = vector.load %arg3[%c0_5, %c0_6, %c0_7] : memref<3x3x8xf32, #tpu.memory_space<vmem>>, vector<1x1x8xf32>
    %20 = vector.shape_cast %19 : vector<1x1x8xf32> to vector<8xf32>
    %21 = vector.shape_cast %20 : vector<8xf32> to vector<1x8xf32>
    %22 = vector.broadcast %21 : vector<1x8xf32> to vector<64x8xf32>
    %23 = arith.mulf %18, %22 : vector<64x8xf32>
    %24 = arith.addf %12, %23 : vector<64x8xf32>
    %c8_i32_8 = arith.constant 8 : i32
    %25 = tpu.dynamic_rotate %1 by %c8_i32_8 dim 0 : vector<64x8xf32>, i32 -> vector<64x8xf32>
    %cst_9 = arith.constant 0.000000e+00 : f32
    %26 = vector.shape_cast %5 : vector<64x1xi1> to vector<64x1xi1>
    %27 = vector.broadcast %26 : vector<64x1xi1> to vector<64x8xi1>
    %28 = vector.broadcast %cst_9 : f32 to vector<64x8xf32>
    %29 = arith.select %27, %25, %28 : vector<64x8xi1>, vector<64x8xf32>
    %c0_10 = arith.constant 0 : index
    %c1 = arith.constant 1 : index
    %c0_11 = arith.constant 0 : index
    %30 = vector.load %arg3[%c0_10, %c1, %c0_11] : memref<3x3x8xf32, #tpu.memory_space<vmem>>, vector<1x1x8xf32>
    %31 = vector.shape_cast %30 : vector<1x1x8xf32> to vector<8xf32>
    %32 = vector.shape_cast %31 : vector<8xf32> to vector<1x8xf32>
    %33 = vector.broadcast %32 : vector<1x8xf32> to vector<64x8xf32>
    %34 = arith.mulf %29, %33 : vector<64x8xf32>
    %35 = arith.addf %24, %34 : vector<64x8xf32>
    %36 = arith.andi %5, %11 : vector<64x1xi1>
    %c7_i32_12 = arith.constant 7 : i32
    %37 = tpu.dynamic_rotate %1 by %c7_i32_12 dim 0 : vector<64x8xf32>, i32 -> vector<64x8xf32>
    %cst_13 = arith.constant 0.000000e+00 : f32
    %38 = vector.shape_cast %36 : vector<64x1xi1> to vector<64x1xi1>
    %39 = vector.broadcast %38 : vector<64x1xi1> to vector<64x8xi1>
    %40 = vector.broadcast %cst_13 : f32 to vector<64x8xf32>
    %41 = arith.select %39, %37, %40 : vector<64x8xi1>, vector<64x8xf32>
    %c0_14 = arith.constant 0 : index
    %c2 = arith.constant 2 : index
    %c0_15 = arith.constant 0 : index
    %42 = vector.load %arg3[%c0_14, %c2, %c0_15] : memref<3x3x8xf32, #tpu.memory_space<vmem>>, vector<1x1x8xf32>
    %43 = vector.shape_cast %42 : vector<1x1x8xf32> to vector<8xf32>
    %44 = vector.shape_cast %43 : vector<8xf32> to vector<1x8xf32>
    %45 = vector.broadcast %44 : vector<1x8xf32> to vector<64x8xf32>
    %46 = arith.mulf %41, %45 : vector<64x8xf32>
    %47 = arith.addf %35, %46 : vector<64x8xf32>
    %c1_i32_16 = arith.constant 1 : i32
    %48 = tpu.dynamic_rotate %1 by %c1_i32_16 dim 0 : vector<64x8xf32>, i32 -> vector<64x8xf32>
    %cst_17 = arith.constant 0.000000e+00 : f32
    %49 = vector.shape_cast %9 : vector<64x1xi1> to vector<64x1xi1>
    %50 = vector.broadcast %49 : vector<64x1xi1> to vector<64x8xi1>
    %51 = vector.broadcast %cst_17 : f32 to vector<64x8xf32>
    %52 = arith.select %50, %48, %51 : vector<64x8xi1>, vector<64x8xf32>
    %c1_18 = arith.constant 1 : index
    %c0_19 = arith.constant 0 : index
    %c0_20 = arith.constant 0 : index
    %53 = vector.load %arg3[%c1_18, %c0_19, %c0_20] : memref<3x3x8xf32, #tpu.memory_space<vmem>>, vector<1x1x8xf32>
    %54 = vector.shape_cast %53 : vector<1x1x8xf32> to vector<8xf32>
    %55 = vector.shape_cast %54 : vector<8xf32> to vector<1x8xf32>
    %56 = vector.broadcast %55 : vector<1x8xf32> to vector<64x8xf32>
    %57 = arith.mulf %52, %56 : vector<64x8xf32>
    %58 = arith.addf %47, %57 : vector<64x8xf32>
    %c1_21 = arith.constant 1 : index
    %c1_22 = arith.constant 1 : index
    %c0_23 = arith.constant 0 : index
    %59 = vector.load %arg3[%c1_21, %c1_22, %c0_23] : memref<3x3x8xf32, #tpu.memory_space<vmem>>, vector<1x1x8xf32>
    %60 = vector.shape_cast %59 : vector<1x1x8xf32> to vector<8xf32>
    %61 = vector.shape_cast %60 : vector<8xf32> to vector<1x8xf32>
    %62 = vector.broadcast %61 : vector<1x8xf32> to vector<64x8xf32>
    %63 = arith.mulf %1, %62 : vector<64x8xf32>
    %64 = arith.addf %58, %63 : vector<64x8xf32>
    %c63_i32 = arith.constant 63 : i32
    %65 = tpu.dynamic_rotate %1 by %c63_i32 dim 0 : vector<64x8xf32>, i32 -> vector<64x8xf32>
    %cst_24 = arith.constant 0.000000e+00 : f32
    %66 = vector.shape_cast %11 : vector<64x1xi1> to vector<64x1xi1>
    %67 = vector.broadcast %66 : vector<64x1xi1> to vector<64x8xi1>
    %68 = vector.broadcast %cst_24 : f32 to vector<64x8xf32>
    %69 = arith.select %67, %65, %68 : vector<64x8xi1>, vector<64x8xf32>
    %c1_25 = arith.constant 1 : index
    %c2_26 = arith.constant 2 : index
    %c0_27 = arith.constant 0 : index
    %70 = vector.load %arg3[%c1_25, %c2_26, %c0_27] : memref<3x3x8xf32, #tpu.memory_space<vmem>>, vector<1x1x8xf32>
    %71 = vector.shape_cast %70 : vector<1x1x8xf32> to vector<8xf32>
    %72 = vector.shape_cast %71 : vector<8xf32> to vector<1x8xf32>
    %73 = vector.broadcast %72 : vector<1x8xf32> to vector<64x8xf32>
    %74 = arith.mulf %69, %73 : vector<64x8xf32>
    %75 = arith.addf %64, %74 : vector<64x8xf32>
    %76 = arith.andi %7, %9 : vector<64x1xi1>
    %c57_i32 = arith.constant 57 : i32
    %77 = tpu.dynamic_rotate %1 by %c57_i32 dim 0 : vector<64x8xf32>, i32 -> vector<64x8xf32>
    %cst_28 = arith.constant 0.000000e+00 : f32
    %78 = vector.shape_cast %76 : vector<64x1xi1> to vector<64x1xi1>
    %79 = vector.broadcast %78 : vector<64x1xi1> to vector<64x8xi1>
    %80 = vector.broadcast %cst_28 : f32 to vector<64x8xf32>
    %81 = arith.select %79, %77, %80 : vector<64x8xi1>, vector<64x8xf32>
    %c2_29 = arith.constant 2 : index
    %c0_30 = arith.constant 0 : index
    %c0_31 = arith.constant 0 : index
    %82 = vector.load %arg3[%c2_29, %c0_30, %c0_31] : memref<3x3x8xf32, #tpu.memory_space<vmem>>, vector<1x1x8xf32>
    %83 = vector.shape_cast %82 : vector<1x1x8xf32> to vector<8xf32>
    %84 = vector.shape_cast %83 : vector<8xf32> to vector<1x8xf32>
    %85 = vector.broadcast %84 : vector<1x8xf32> to vector<64x8xf32>
    %86 = arith.mulf %81, %85 : vector<64x8xf32>
    %87 = arith.addf %75, %86 : vector<64x8xf32>
    %c56_i32_32 = arith.constant 56 : i32
    %88 = tpu.dynamic_rotate %1 by %c56_i32_32 dim 0 : vector<64x8xf32>, i32 -> vector<64x8xf32>
    %cst_33 = arith.constant 0.000000e+00 : f32
    %89 = vector.shape_cast %7 : vector<64x1xi1> to vector<64x1xi1>
    %90 = vector.broadcast %89 : vector<64x1xi1> to vector<64x8xi1>
    %91 = vector.broadcast %cst_33 : f32 to vector<64x8xf32>
    %92 = arith.select %90, %88, %91 : vector<64x8xi1>, vector<64x8xf32>
    %c2_34 = arith.constant 2 : index
    %c1_35 = arith.constant 1 : index
    %c0_36 = arith.constant 0 : index
    %93 = vector.load %arg3[%c2_34, %c1_35, %c0_36] : memref<3x3x8xf32, #tpu.memory_space<vmem>>, vector<1x1x8xf32>
    %94 = vector.shape_cast %93 : vector<1x1x8xf32> to vector<8xf32>
    %95 = vector.shape_cast %94 : vector<8xf32> to vector<1x8xf32>
    %96 = vector.broadcast %95 : vector<1x8xf32> to vector<64x8xf32>
    %97 = arith.mulf %92, %96 : vector<64x8xf32>
    %98 = arith.addf %87, %97 : vector<64x8xf32>
    %99 = arith.andi %7, %11 : vector<64x1xi1>
    %c55_i32 = arith.constant 55 : i32
    %100 = tpu.dynamic_rotate %1 by %c55_i32 dim 0 : vector<64x8xf32>, i32 -> vector<64x8xf32>
    %cst_37 = arith.constant 0.000000e+00 : f32
    %101 = vector.shape_cast %99 : vector<64x1xi1> to vector<64x1xi1>
    %102 = vector.broadcast %101 : vector<64x1xi1> to vector<64x8xi1>
    %103 = vector.broadcast %cst_37 : f32 to vector<64x8xf32>
    %104 = arith.select %102, %100, %103 : vector<64x8xi1>, vector<64x8xf32>
    %c2_38 = arith.constant 2 : index
    %c2_39 = arith.constant 2 : index
    %c0_40 = arith.constant 0 : index
    %105 = vector.load %arg3[%c2_38, %c2_39, %c0_40] : memref<3x3x8xf32, #tpu.memory_space<vmem>>, vector<1x1x8xf32>
    %106 = vector.shape_cast %105 : vector<1x1x8xf32> to vector<8xf32>
    %107 = vector.shape_cast %106 : vector<8xf32> to vector<1x8xf32>
    %108 = vector.broadcast %107 : vector<1x8xf32> to vector<64x8xf32>
    %109 = arith.mulf %104, %108 : vector<64x8xf32>
    %110 = arith.addf %98, %109 : vector<64x8xf32>
    %111 = arith.addf %1, %110 : vector<64x8xf32>
    %c0_41 = arith.constant 0 : index
    %c0_42 = arith.constant 0 : index
    %112 = vector.load %arg4[%c0_41, %c0_42] : memref<1x8xf32, #tpu.memory_space<vmem>>, vector<1x8xf32>
    %113 = vector.shape_cast %112 : vector<1x8xf32> to vector<8xf32>
    %114 = vector.shape_cast %113 : vector<8xf32> to vector<1x8xf32>
    %115 = vector.broadcast %114 : vector<1x8xf32> to vector<64x8xf32>
    %116 = arith.addf %111, %115 : vector<64x8xf32>
    %cst_43 = arith.constant dense<0.000000e+00> : vector<64xf32>
    %117 = vector.multi_reduction <add>, %116, %cst_43 [1] : vector<64x8xf32> to vector<64xf32>
    %118 = vector.shape_cast %117 : vector<64xf32> to vector<64x1xf32>
    %cst_44 = arith.constant 8.000000e+00 : f32
    %119 = vector.broadcast %cst_44 : f32 to vector<64x1xf32>
    %120 = arith.divf %118, %119 : vector<64x1xf32>
    %121 = vector.broadcast %120 : vector<64x1xf32> to vector<64x8xf32>
    %122 = arith.subf %116, %121 : vector<64x8xf32>
    %123 = arith.mulf %122, %122 : vector<64x8xf32>
    %cst_45 = arith.constant dense<0.000000e+00> : vector<64xf32>
    %124 = vector.multi_reduction <add>, %123, %cst_45 [1] : vector<64x8xf32> to vector<64xf32>
    %125 = vector.shape_cast %124 : vector<64xf32> to vector<64x1xf32>
    %cst_46 = arith.constant 8.000000e+00 : f32
    %126 = vector.broadcast %cst_46 : f32 to vector<64x1xf32>
    %127 = arith.divf %125, %126 : vector<64x1xf32>
    %128 = vector.broadcast %120 : vector<64x1xf32> to vector<64x8xf32>
    %129 = arith.subf %116, %128 : vector<64x8xf32>
    %cst_47 = arith.constant 9.99999974E-6 : f32
    %130 = vector.broadcast %cst_47 : f32 to vector<64x1xf32>
    %131 = arith.addf %127, %130 : vector<64x1xf32>
    %132 = math.rsqrt %131 : vector<64x1xf32>
    %133 = vector.broadcast %132 : vector<64x1xf32> to vector<64x8xf32>
    %134 = arith.mulf %129, %133 : vector<64x8xf32>
    %c0_48 = arith.constant 0 : index
    %c0_49 = arith.constant 0 : index
    %135 = vector.load %arg5[%c0_48, %c0_49] : memref<1x8xf32, #tpu.memory_space<vmem>>, vector<1x8xf32>
    %136 = vector.shape_cast %135 : vector<1x8xf32> to vector<8xf32>
    %137 = vector.shape_cast %136 : vector<8xf32> to vector<1x8xf32>
    %138 = vector.broadcast %137 : vector<1x8xf32> to vector<64x8xf32>
    %139 = arith.mulf %134, %138 : vector<64x8xf32>
    %c0_50 = arith.constant 0 : index
    %c0_51 = arith.constant 0 : index
    %140 = vector.load %arg6[%c0_50, %c0_51] : memref<1x8xf32, #tpu.memory_space<vmem>>, vector<1x8xf32>
    %141 = vector.shape_cast %140 : vector<1x8xf32> to vector<8xf32>
    %142 = vector.shape_cast %141 : vector<8xf32> to vector<1x8xf32>
    %143 = vector.broadcast %142 : vector<1x8xf32> to vector<64x8xf32>
    %144 = arith.addf %139, %143 : vector<64x8xf32>
    %cst_52 = arith.constant 0.000000e+00 : f32
    %145 = vector.broadcast %cst_52 : f32 to vector<64x8xf32>
    %c0_53 = arith.constant 0 : index
    %c0_54 = arith.constant 0 : index
    %c0_55 = arith.constant 0 : index
    %146 = vector.load %arg7[%c0_53, %c0_54, %c0_55] : memref<2x8x4xf32, #tpu.memory_space<vmem>>, vector<1x8x4xf32>
    %147 = vector.shape_cast %146 : vector<1x8x4xf32> to vector<8x4xf32>
    %148 = arith.truncf %144 : vector<64x8xf32> to vector<64x8xbf16>
    %149 = arith.truncf %147 : vector<8x4xf32> to vector<8x4xbf16>
    %cst_56 = arith.constant dense<0.000000e+00> : vector<64x4xf32>
    %150 = tpu.matmul %148, %149, %cst_56 {dimension_numbers = #tpu.dot_dimension_numbers<[1], [0], [0], [1], [0, 0, 1, 1], [], []>} : vector<64x8xbf16>, vector<8x4xbf16>, vector<64x4xf32> -> vector<64x4xf32>
    %c0_57 = arith.constant 0 : index
    %c0_58 = arith.constant 0 : index
    %c0_59 = arith.constant 0 : index
    %151 = vector.load %arg8[%c0_57, %c0_58, %c0_59] : memref<2x8x4xf32, #tpu.memory_space<vmem>>, vector<1x8x4xf32>
    %152 = vector.shape_cast %151 : vector<1x8x4xf32> to vector<8x4xf32>
    %153 = arith.truncf %144 : vector<64x8xf32> to vector<64x8xbf16>
    %154 = arith.truncf %152 : vector<8x4xf32> to vector<8x4xbf16>
    %cst_60 = arith.constant dense<0.000000e+00> : vector<64x4xf32>
    %155 = tpu.matmul %153, %154, %cst_60 {dimension_numbers = #tpu.dot_dimension_numbers<[1], [0], [0], [1], [0, 0, 1, 1], [], []>} : vector<64x8xbf16>, vector<8x4xbf16>, vector<64x4xf32> -> vector<64x4xf32>
    %c0_61 = arith.constant 0 : index
    %c0_62 = arith.constant 0 : index
    %c0_63 = arith.constant 0 : index
    %156 = vector.load %arg9[%c0_61, %c0_62, %c0_63] : memref<2x8x4xf32, #tpu.memory_space<vmem>>, vector<1x8x4xf32>
    %157 = vector.shape_cast %156 : vector<1x8x4xf32> to vector<8x4xf32>
    %158 = arith.truncf %144 : vector<64x8xf32> to vector<64x8xbf16>
    %159 = arith.truncf %157 : vector<8x4xf32> to vector<8x4xbf16>
    %cst_64 = arith.constant dense<0.000000e+00> : vector<64x4xf32>
    %160 = tpu.matmul %158, %159, %cst_64 {dimension_numbers = #tpu.dot_dimension_numbers<[1], [0], [0], [1], [0, 0, 1, 1], [], []>} : vector<64x8xbf16>, vector<8x4xbf16>, vector<64x4xf32> -> vector<64x4xf32>
    %161 = arith.truncf %150 : vector<64x4xf32> to vector<64x4xbf16>
    %162 = arith.truncf %155 : vector<64x4xf32> to vector<64x4xbf16>
    %cst_65 = arith.constant dense<0.000000e+00> : vector<64x64xf32>
    %163 = tpu.matmul %161, %162, %cst_65 {dimension_numbers = #tpu.dot_dimension_numbers<[1], [1], [0], [0], [0, 0, 1, 0], [], []>} : vector<64x4xbf16>, vector<64x4xbf16>, vector<64x64xf32> -> vector<64x64xf32>
    %cst_66 = arith.constant dense<0xFF800000> : vector<64xf32>
    %164 = vector.multi_reduction <maximumf>, %163, %cst_66 [1] : vector<64x64xf32> to vector<64xf32>
    %165 = vector.shape_cast %164 : vector<64xf32> to vector<64x1xf32>
    %166 = vector.broadcast %165 : vector<64x1xf32> to vector<64x64xf32>
    %167 = arith.subf %163, %166 : vector<64x64xf32>
    %168 = math.exp %167 : vector<64x64xf32>
    %cst_67 = arith.constant dense<0.000000e+00> : vector<64xf32>
    %169 = vector.multi_reduction <add>, %168, %cst_67 [1] : vector<64x64xf32> to vector<64xf32>
    %170 = vector.shape_cast %169 : vector<64xf32> to vector<64x1xf32>
    %171 = tpu.reciprocal %170 {approx = true} : vector<64x1xf32> -> vector<64x1xf32>
    %172 = vector.broadcast %171 : vector<64x1xf32> to vector<64x64xf32>
    %173 = arith.mulf %168, %172 : vector<64x64xf32>
    %174 = arith.truncf %173 : vector<64x64xf32> to vector<64x64xbf16>
    %175 = arith.truncf %160 : vector<64x4xf32> to vector<64x4xbf16>
    %cst_68 = arith.constant dense<0.000000e+00> : vector<64x4xf32>
    %176 = tpu.matmul %174, %175, %cst_68 {dimension_numbers = #tpu.dot_dimension_numbers<[1], [0], [0], [1], [0, 0, 1, 1], [], []>} : vector<64x64xbf16>, vector<64x4xbf16>, vector<64x4xf32> -> vector<64x4xf32>
    %c0_69 = arith.constant 0 : index
    %c0_70 = arith.constant 0 : index
    %c0_71 = arith.constant 0 : index
    %177 = vector.load %arg10[%c0_69, %c0_70, %c0_71] : memref<2x4x8xf32, #tpu.memory_space<vmem>>, vector<1x4x8xf32>
    %178 = vector.shape_cast %177 : vector<1x4x8xf32> to vector<4x8xf32>
    %179 = arith.truncf %176 : vector<64x4xf32> to vector<64x4xbf16>
    %180 = arith.truncf %178 : vector<4x8xf32> to vector<4x8xbf16>
    %cst_72 = arith.constant dense<0.000000e+00> : vector<64x8xf32>
    %181 = tpu.matmul %179, %180, %cst_72 {dimension_numbers = #tpu.dot_dimension_numbers<[1], [0], [0], [1], [0, 0, 1, 1], [], []>} : vector<64x4xbf16>, vector<4x8xbf16>, vector<64x8xf32> -> vector<64x8xf32>
    %182 = arith.addf %145, %181 : vector<64x8xf32>
    %c1_73 = arith.constant 1 : index
    %c0_74 = arith.constant 0 : index
    %c0_75 = arith.constant 0 : index
    %183 = vector.load %arg7[%c1_73, %c0_74, %c0_75] : memref<2x8x4xf32, #tpu.memory_space<vmem>>, vector<1x8x4xf32>
    %184 = vector.shape_cast %183 : vector<1x8x4xf32> to vector<8x4xf32>
    %185 = arith.truncf %144 : vector<64x8xf32> to vector<64x8xbf16>
    %186 = arith.truncf %184 : vector<8x4xf32> to vector<8x4xbf16>
    %cst_76 = arith.constant dense<0.000000e+00> : vector<64x4xf32>
    %187 = tpu.matmul %185, %186, %cst_76 {dimension_numbers = #tpu.dot_dimension_numbers<[1], [0], [0], [1], [0, 0, 1, 1], [], []>} : vector<64x8xbf16>, vector<8x4xbf16>, vector<64x4xf32> -> vector<64x4xf32>
    %c1_77 = arith.constant 1 : index
    %c0_78 = arith.constant 0 : index
    %c0_79 = arith.constant 0 : index
    %188 = vector.load %arg8[%c1_77, %c0_78, %c0_79] : memref<2x8x4xf32, #tpu.memory_space<vmem>>, vector<1x8x4xf32>
    %189 = vector.shape_cast %188 : vector<1x8x4xf32> to vector<8x4xf32>
    %190 = arith.truncf %144 : vector<64x8xf32> to vector<64x8xbf16>
    %191 = arith.truncf %189 : vector<8x4xf32> to vector<8x4xbf16>
    %cst_80 = arith.constant dense<0.000000e+00> : vector<64x4xf32>
    %192 = tpu.matmul %190, %191, %cst_80 {dimension_numbers = #tpu.dot_dimension_numbers<[1], [0], [0], [1], [0, 0, 1, 1], [], []>} : vector<64x8xbf16>, vector<8x4xbf16>, vector<64x4xf32> -> vector<64x4xf32>
    %c1_81 = arith.constant 1 : index
    %c0_82 = arith.constant 0 : index
    %c0_83 = arith.constant 0 : index
    %193 = vector.load %arg9[%c1_81, %c0_82, %c0_83] : memref<2x8x4xf32, #tpu.memory_space<vmem>>, vector<1x8x4xf32>
    %194 = vector.shape_cast %193 : vector<1x8x4xf32> to vector<8x4xf32>
    %195 = arith.truncf %144 : vector<64x8xf32> to vector<64x8xbf16>
    %196 = arith.truncf %194 : vector<8x4xf32> to vector<8x4xbf16>
    %cst_84 = arith.constant dense<0.000000e+00> : vector<64x4xf32>
    %197 = tpu.matmul %195, %196, %cst_84 {dimension_numbers = #tpu.dot_dimension_numbers<[1], [0], [0], [1], [0, 0, 1, 1], [], []>} : vector<64x8xbf16>, vector<8x4xbf16>, vector<64x4xf32> -> vector<64x4xf32>
    %198 = arith.truncf %187 : vector<64x4xf32> to vector<64x4xbf16>
    %199 = arith.truncf %192 : vector<64x4xf32> to vector<64x4xbf16>
    %cst_85 = arith.constant dense<0.000000e+00> : vector<64x64xf32>
    %200 = tpu.matmul %198, %199, %cst_85 {dimension_numbers = #tpu.dot_dimension_numbers<[1], [1], [0], [0], [0, 0, 1, 0], [], []>} : vector<64x4xbf16>, vector<64x4xbf16>, vector<64x64xf32> -> vector<64x64xf32>
    %cst_86 = arith.constant dense<0xFF800000> : vector<64xf32>
    %201 = vector.multi_reduction <maximumf>, %200, %cst_86 [1] : vector<64x64xf32> to vector<64xf32>
    %202 = vector.shape_cast %201 : vector<64xf32> to vector<64x1xf32>
    %203 = vector.broadcast %202 : vector<64x1xf32> to vector<64x64xf32>
    %204 = arith.subf %200, %203 : vector<64x64xf32>
    %205 = math.exp %204 : vector<64x64xf32>
    %cst_87 = arith.constant dense<0.000000e+00> : vector<64xf32>
    %206 = vector.multi_reduction <add>, %205, %cst_87 [1] : vector<64x64xf32> to vector<64xf32>
    %207 = vector.shape_cast %206 : vector<64xf32> to vector<64x1xf32>
    %208 = tpu.reciprocal %207 {approx = true} : vector<64x1xf32> -> vector<64x1xf32>
    %209 = vector.broadcast %208 : vector<64x1xf32> to vector<64x64xf32>
    %210 = arith.mulf %205, %209 : vector<64x64xf32>
    %211 = arith.truncf %210 : vector<64x64xf32> to vector<64x64xbf16>
    %212 = arith.truncf %197 : vector<64x4xf32> to vector<64x4xbf16>
    %cst_88 = arith.constant dense<0.000000e+00> : vector<64x4xf32>
    %213 = tpu.matmul %211, %212, %cst_88 {dimension_numbers = #tpu.dot_dimension_numbers<[1], [0], [0], [1], [0, 0, 1, 1], [], []>} : vector<64x64xbf16>, vector<64x4xbf16>, vector<64x4xf32> -> vector<64x4xf32>
    %c1_89 = arith.constant 1 : index
    %c0_90 = arith.constant 0 : index
    %c0_91 = arith.constant 0 : index
    %214 = vector.load %arg10[%c1_89, %c0_90, %c0_91] : memref<2x4x8xf32, #tpu.memory_space<vmem>>, vector<1x4x8xf32>
    %215 = vector.shape_cast %214 : vector<1x4x8xf32> to vector<4x8xf32>
    %216 = arith.truncf %213 : vector<64x4xf32> to vector<64x4xbf16>
    %217 = arith.truncf %215 : vector<4x8xf32> to vector<4x8xbf16>
    %cst_92 = arith.constant dense<0.000000e+00> : vector<64x8xf32>
    %218 = tpu.matmul %216, %217, %cst_92 {dimension_numbers = #tpu.dot_dimension_numbers<[1], [0], [0], [1], [0, 0, 1, 1], [], []>} : vector<64x4xbf16>, vector<4x8xbf16>, vector<64x8xf32> -> vector<64x8xf32>
    %219 = arith.addf %182, %218 : vector<64x8xf32>
    %220 = arith.addf %116, %219 : vector<64x8xf32>
    %c0_93 = arith.constant 0 : index
    %c0_94 = arith.constant 0 : index
    %221 = vector.load %arg11[%c0_93, %c0_94] : memref<1x8xf32, #tpu.memory_space<vmem>>, vector<1x8xf32>
    %222 = vector.shape_cast %221 : vector<1x8xf32> to vector<8xf32>
    %223 = vector.shape_cast %222 : vector<8xf32> to vector<1x8xf32>
    %224 = vector.broadcast %223 : vector<1x8xf32> to vector<64x8xf32>
    %225 = arith.addf %220, %224 : vector<64x8xf32>
    %cst_95 = arith.constant dense<0.000000e+00> : vector<64xf32>
    %226 = vector.multi_reduction <add>, %225, %cst_95 [1] : vector<64x8xf32> to vector<64xf32>
    %227 = vector.shape_cast %226 : vector<64xf32> to vector<64x1xf32>
    %cst_96 = arith.constant 8.000000e+00 : f32
    %228 = vector.broadcast %cst_96 : f32 to vector<64x1xf32>
    %229 = arith.divf %227, %228 : vector<64x1xf32>
    %230 = vector.broadcast %229 : vector<64x1xf32> to vector<64x8xf32>
    %231 = arith.subf %225, %230 : vector<64x8xf32>
    %232 = arith.mulf %231, %231 : vector<64x8xf32>
    %cst_97 = arith.constant dense<0.000000e+00> : vector<64xf32>
    %233 = vector.multi_reduction <add>, %232, %cst_97 [1] : vector<64x8xf32> to vector<64xf32>
    %234 = vector.shape_cast %233 : vector<64xf32> to vector<64x1xf32>
    %cst_98 = arith.constant 8.000000e+00 : f32
    %235 = vector.broadcast %cst_98 : f32 to vector<64x1xf32>
    %236 = arith.divf %234, %235 : vector<64x1xf32>
    %237 = vector.broadcast %229 : vector<64x1xf32> to vector<64x8xf32>
    %238 = arith.subf %225, %237 : vector<64x8xf32>
    %cst_99 = arith.constant 9.99999974E-6 : f32
    %239 = vector.broadcast %cst_99 : f32 to vector<64x1xf32>
    %240 = arith.addf %236, %239 : vector<64x1xf32>
    %241 = math.rsqrt %240 : vector<64x1xf32>
    %242 = vector.broadcast %241 : vector<64x1xf32> to vector<64x8xf32>
    %243 = arith.mulf %238, %242 : vector<64x8xf32>
    %c0_100 = arith.constant 0 : index
    %c0_101 = arith.constant 0 : index
    %244 = vector.load %arg12[%c0_100, %c0_101] : memref<1x8xf32, #tpu.memory_space<vmem>>, vector<1x8xf32>
    %245 = vector.shape_cast %244 : vector<1x8xf32> to vector<8xf32>
    %246 = vector.shape_cast %245 : vector<8xf32> to vector<1x8xf32>
    %247 = vector.broadcast %246 : vector<1x8xf32> to vector<64x8xf32>
    %248 = arith.mulf %243, %247 : vector<64x8xf32>
    %c0_102 = arith.constant 0 : index
    %c0_103 = arith.constant 0 : index
    %249 = vector.load %arg13[%c0_102, %c0_103] : memref<1x8xf32, #tpu.memory_space<vmem>>, vector<1x8xf32>
    %250 = vector.shape_cast %249 : vector<1x8xf32> to vector<8xf32>
    %251 = vector.shape_cast %250 : vector<8xf32> to vector<1x8xf32>
    %252 = vector.broadcast %251 : vector<1x8xf32> to vector<64x8xf32>
    %253 = arith.addf %248, %252 : vector<64x8xf32>
    %c0_104 = arith.constant 0 : index
    %c0_105 = arith.constant 0 : index
    %254 = vector.load %arg14[%c0_104, %c0_105] : memref<8x8xf32, #tpu.memory_space<vmem>>, vector<8x8xf32>
    %255 = arith.truncf %253 : vector<64x8xf32> to vector<64x8xbf16>
    %256 = arith.truncf %254 : vector<8x8xf32> to vector<8x8xbf16>
    %cst_106 = arith.constant dense<0.000000e+00> : vector<64x8xf32>
    %257 = tpu.matmul %255, %256, %cst_106 {dimension_numbers = #tpu.dot_dimension_numbers<[1], [0], [0], [1], [0, 0, 1, 1], [], []>} : vector<64x8xbf16>, vector<8x8xbf16>, vector<64x8xf32> -> vector<64x8xf32>
    %c0_107 = arith.constant 0 : index
    %c0_108 = arith.constant 0 : index
    %258 = vector.load %arg15[%c0_107, %c0_108] : memref<1x8xf32, #tpu.memory_space<vmem>>, vector<1x8xf32>
    %259 = vector.shape_cast %258 : vector<1x8xf32> to vector<8xf32>
    %260 = vector.shape_cast %259 : vector<8xf32> to vector<1x8xf32>
    %261 = vector.broadcast %260 : vector<1x8xf32> to vector<64x8xf32>
    %262 = arith.addf %257, %261 : vector<64x8xf32>
    %cst_109 = arith.constant 5.000000e-01 : f32
    %263 = vector.broadcast %cst_109 : f32 to vector<64x8xf32>
    %264 = arith.mulf %263, %262 : vector<64x8xf32>
    %cst_110 = arith.constant 0.707106769 : f32
    %265 = vector.broadcast %cst_110 : f32 to vector<64x8xf32>
    %266 = arith.mulf %262, %265 : vector<64x8xf32>
    %267 = math.erf %266 : vector<64x8xf32>
    %cst_111 = arith.constant 1.000000e+00 : f32
    %268 = vector.broadcast %cst_111 : f32 to vector<64x8xf32>
    %269 = arith.addf %268, %267 : vector<64x8xf32>
    %270 = arith.mulf %264, %269 : vector<64x8xf32>
    %c0_112 = arith.constant 0 : index
    %c0_113 = arith.constant 0 : index
    %271 = vector.load %arg16[%c0_112, %c0_113] : memref<8x8xf32, #tpu.memory_space<vmem>>, vector<8x8xf32>
    %272 = arith.truncf %270 : vector<64x8xf32> to vector<64x8xbf16>
    %273 = arith.truncf %271 : vector<8x8xf32> to vector<8x8xbf16>
    %cst_114 = arith.constant dense<0.000000e+00> : vector<64x8xf32>
    %274 = tpu.matmul %272, %273, %cst_114 {dimension_numbers = #tpu.dot_dimension_numbers<[1], [0], [0], [1], [0, 0, 1, 1], [], []>} : vector<64x8xbf16>, vector<8x8xbf16>, vector<64x8xf32> -> vector<64x8xf32>
    %275 = arith.addf %225, %274 : vector<64x8xf32>
    %c0_115 = arith.constant 0 : index
    %c0_116 = arith.constant 0 : index
    %276 = vector.load %arg17[%c0_115, %c0_116] : memref<1x8xf32, #tpu.memory_space<vmem>>, vector<1x8xf32>
    %277 = vector.shape_cast %276 : vector<1x8xf32> to vector<8xf32>
    %278 = vector.shape_cast %277 : vector<8xf32> to vector<1x8xf32>
    %279 = vector.broadcast %278 : vector<1x8xf32> to vector<64x8xf32>
    %280 = arith.addf %275, %279 : vector<64x8xf32>
    %c0_117 = arith.constant 0 : index
    %c0_118 = arith.constant 0 : index
    %c0_119 = arith.constant 0 : index
    %281 = vector.load %arg18[%c0_117, %c0_118, %c0_119] : memref<1x64x8xf32, #tpu.memory_space<vmem>>, vector<1x64x8xf32>
    %282 = vector.shape_cast %281 : vector<1x64x8xf32> to vector<64x8xf32>
    %283 = vector.shape_cast %280 : vector<64x8xf32> to vector<1x64x8xf32>
    tpu.vector_store %arg18[%c0_117, %c0_118, %c0_119], %283 {strides = array<i32>} : memref<1x64x8xf32, #tpu.memory_space<vmem>>, vector<1x64x8xf32>,
    return
  }
  func.func @transform_0(%arg0: i32) -> (i32, i32, i32) {
    %c0_i32 = arith.constant 0 : i32
    %c0_i32_0 = arith.constant 0 : i32
    %c0_i32_1 = arith.constant 0 : i32
    return %arg0, %c0_i32, %c0_i32_0 : i32, i32, i32
  }
  func.func @transform_1(%arg0: i32) -> (i32, i32) {
    %c0_i32 = arith.constant 0 : i32
    %c0_i32_0 = arith.constant 0 : i32
    %c0_i32_1 = arith.constant 0 : i32
    return %c0_i32, %c0_i32_0 : i32, i32
  }
  func.func @transform_2(%arg0: i32) -> (i32, i32, i32) {
    %c0_i32 = arith.constant 0 : i32
    %c0_i32_0 = arith.constant 0 : i32
    %c0_i32_1 = arith.constant 0 : i32
    %c0_i32_2 = arith.constant 0 : i32
    return %c0_i32, %c0_i32_0, %c0_i32_1 : i32, i32, i32
  }
  func.func @transform_3(%arg0: i32) -> (i32, i32) {
    %c0_i32 = arith.constant 0 : i32
    %c0_i32_0 = arith.constant 0 : i32
    %c0_i32_1 = arith.constant 0 : i32
    return %c0_i32, %c0_i32_0 : i32, i32
  }
  func.func @transform_4(%arg0: i32) -> (i32, i32) {
    %c0_i32 = arith.constant 0 : i32
    %c0_i32_0 = arith.constant 0 : i32
    %c0_i32_1 = arith.constant 0 : i32
    return %c0_i32, %c0_i32_0 : i32, i32
  }
  func.func @transform_5(%arg0: i32) -> (i32, i32) {
    %c0_i32 = arith.constant 0 : i32
    %c0_i32_0 = arith.constant 0 : i32
    %c0_i32_1 = arith.constant 0 : i32
    return %c0_i32, %c0_i32_0 : i32, i32
  }
  func.func @transform_6(%arg0: i32) -> (i32, i32, i32) {
    %c0_i32 = arith.constant 0 : i32
    %c0_i32_0 = arith.constant 0 : i32
    %c0_i32_1 = arith.constant 0 : i32
    %c0_i32_2 = arith.constant 0 : i32
    return %c0_i32, %c0_i32_0, %c0_i32_1 : i32, i32, i32
  }
  func.func @transform_7(%arg0: i32) -> (i32, i32, i32) {
    %c0_i32 = arith.constant 0 : i32
    %c0_i32_0 = arith.constant 0 : i32
    %c0_i32_1 = arith.constant 0 : i32
    %c0_i32_2 = arith.constant 0 : i32
    return %c0_i32, %c0_i32_0, %c0_i32_1 : i32, i32, i32
  }
  func.func @transform_8(%arg0: i32) -> (i32, i32, i32) {
    %c0_i32 = arith.constant 0 : i32
    %c0_i32_0 = arith.constant 0 : i32
    %c0_i32_1 = arith.constant 0 : i32
    %c0_i32_2 = arith.constant 0 : i32
    return %c0_i32, %c0_i32_0, %c0_i32_1 : i32, i32, i32
  }
  func.func @transform_9(%arg0: i32) -> (i32, i32, i32) {
    %c0_i32 = arith.constant 0 : i32
    %c0_i32_0 = arith.constant 0 : i32
    %c0_i32_1 = arith.constant 0 : i32
    %c0_i32_2 = arith.constant 0 : i32
    return %c0_i32, %c0_i32_0, %c0_i32_1 : i32, i32, i32
  }
  func.func @transform_10(%arg0: i32) -> (i32, i32) {
    %c0_i32 = arith.constant 0 : i32
    %c0_i32_0 = arith.constant 0 : i32
    %c0_i32_1 = arith.constant 0 : i32
    return %c0_i32, %c0_i32_0 : i32, i32
  }
  func.func @transform_11(%arg0: i32) -> (i32, i32) {
    %c0_i32 = arith.constant 0 : i32
    %c0_i32_0 = arith.constant 0 : i32
    %c0_i32_1 = arith.constant 0 : i32
    return %c0_i32, %c0_i32_0 : i32, i32
  }
  func.func @transform_12(%arg0: i32) -> (i32, i32) {
    %c0_i32 = arith.constant 0 : i32
    %c0_i32_0 = arith.constant 0 : i32
    %c0_i32_1 = arith.constant 0 : i32
    return %c0_i32, %c0_i32_0 : i32, i32
  }
  func.func @transform_13(%arg0: i32) -> (i32, i32) {
    %c0_i32 = arith.constant 0 : i32
    %c0_i32_0 = arith.constant 0 : i32
    %c0_i32_1 = arith.constant 0 : i32
    return %c0_i32, %c0_i32_0 : i32, i32
  }
  func.func @transform_14(%arg0: i32) -> (i32, i32) {
    %c0_i32 = arith.constant 0 : i32
    %c0_i32_0 = arith.constant 0 : i32
    %c0_i32_1 = arith.constant 0 : i32
    return %c0_i32, %c0_i32_0 : i32, i32
  }
  func.func @transform_15(%arg0: i32) -> (i32, i32) {
    %c0_i32 = arith.constant 0 : i32
    %c0_i32_0 = arith.constant 0 : i32
    %c0_i32_1 = arith.constant 0 : i32
    return %c0_i32, %c0_i32_0 : i32, i32
  }
  func.func @transform_16(%arg0: i32) -> (i32, i32) {
    %c0_i32 = arith.constant 0 : i32
    %c0_i32_0 = arith.constant 0 : i32
    %c0_i32_1 = arith.constant 0 : i32
    return %c0_i32, %c0_i32_0 : i32, i32
  }
  func.func @transform_17(%arg0: i32) -> (i32, i32, i32) {
    %c0_i32 = arith.constant 0 : i32
    %c0_i32_0 = arith.constant 0 : i32
    %c0_i32_1 = arith.constant 0 : i32
    return %arg0, %c0_i32, %c0_i32_0 : i32, i32, i32
  }
}

</mosaic_0001>

<bundles_post_ra>
// kernel: tpu_custom_call.1
= control target key start
LH: loop header
LB: loop body
LE: loop exit
PB: predicated region body
PF: predicated region fallthrough
CT: control target
= control target key end

     0   :  { %s3564_s24 = smov 0   ;;  %s4529_s0 = inlined_call_operand.vmem [shape: f32[2,64,8], index: 0, kind: input, shape index: {}]   ;;  %s4530_s1 = inlined_call_operand.vmem [shape: s32[64,1], index: 1, kind: input, shape index: {}]   ;;  %s4531_s2 = inlined_call_operand.vmem [shape: f32[3,3,8], index: 2, kind: input, shape index: {}]   ;;  %s4532_s3 = inlined_call_operand.vmem [shape: f32[1,8], index: 3, kind: input, shape index: {}]   ;;  %s4533_s4 = inlined_call_operand.vmem [shape: f32[1,8], index: 4, kind: input, shape index: {}]   ;;  %s4534_s5 = inlined_call_operand.vmem [shape: f32[1,8], index: 5, kind: input, shape index: {}]   ;;  %s4535_s6 = inlined_call_operand.vmem [shape: f32[2,8,4], index: 6, kind: input, shape index: {}]   ;;  %s4536_s7 = inlined_call_operand.vmem [shape: f32[2,8,4], index: 7, kind: input, shape index: {}]   ;;  %s4537_s8 = inlined_call_operand.vmem [shape: f32[2,8,4], index: 8, kind: input, shape index: {}]   ;;  %s4538_s9 = inlined_call_operand.vmem [shape: f32[2,4,8], index: 9, kind: input, shape index: {}]   ;;  %s4539_s10 = inlined_call_operand.vmem [shape: f32[1,8], index: 10, kind: input, shape index: {}]   ;;  %s4540_s11 = inlined_call_operand.vmem [shape: f32[1,8], index: 11, kind: input, shape index: {}]   ;;  %s4541_s12 = inlined_call_operand.vmem [shape: f32[1,8], index: 12, kind: input, shape index: {}]   ;;  %s4542_s13 = inlined_call_operand.vmem [shape: f32[8,8], index: 13, kind: input, shape index: {}]   ;;  %s4543_s14 = inlined_call_operand.vmem [shape: f32[1,8], index: 14, kind: input, shape index: {}]   ;;  %s4544_s15 = inlined_call_operand.vmem [shape: f32[8,8], index: 15, kind: input, shape index: {}]   ;;  %s4545_s16 = inlined_call_operand.vmem [shape: f32[1,8], index: 16, kind: input, shape index: {}]   ;;  %s4546_s17 = inlined_call_operand.vmem [shape: f32[2,64,8], index: 17, kind: output, shape index: {}]  }
   0x1   :  { %4558 = sst [smem:[#allocation12_spill]] %s4529_s0 }
   0x2   :  { %4559 = sst [smem:[#allocation13_spill]] %s4530_s1 }
   0x3 LB: > { %s2977_s25 = sadd.s32 4294967295, %s3471_s24   ;;  %p2981_p0 = scmp.ge.s32.totalorder %s3471_s24, 1  ;;  %s3471_s24 = sphi %s3564_s24, %s27_s24  }
   0x4   : > { %p487_p1 = scmp.lt.s32.totalorder %s3471_s24, 3 }
   0x6   : > { %p488_p2 = pnand %p2981_p0, %p487_p1 }
   0x8   : > { %491 = sbr.rel (%p488_p2) target bundleno = 3197 (0xc7d), region = 88 }
   0xd   : > { %s4560_s28 = sld [smem:[#allocation13_spill]]  ;;  %v3473_v3 = vmov 0   ;;  %p539_p3 = scmp.lt.s32.totalorder %s2977_s25, 1  ;;  %v558_v33 = vlaneseq  ;;  %v2987_v52 = vld [vmem:[%s4531_s2 + $0x1] ss:$0 sm:$0xff] }
   0xe   : > { %3352 = vset.pattern.permute.xlu1 %v3473_v3  ;;  %3346 = vset.pattern.permute.xlu0 %v3473_v3  ;;  %s4561_s1 = sld [smem:[#allocation12_spill]] }
   0xf   : > { %3348 = vperm.xlu0 %3346, %v3473_v3   ;;  %s4588_s25 = smov (!%p539_p3, %s2977_s25), 1  ;;  %v3657_v38 = vshrl.u32 %v558_v33, 7 }
  0x10   : > { %s3071_s30 = sshll.u32 %s4588_s25, 6 }
  0x11   : > { %s548_s22 = scalar_lea.vmem %s4546_s17, %s3071_s30 }
  0x13   : > { %v569_v0 = vld [vmem:[%s4560_s28 + $0x10] sm:$0xff]  ;;  %v570_v1 = vld [vmem:[%s4560_s28 + $0x18] sm:$0xff]  ;;  %v568_v2 = vld [vmem:[%s4560_s28 + $0x8] sm:$0xff] }
  0x14   : > { %vm593_vm0 = vcmp.ge.s32.totalorder %v569_v0, 1  ;;  %vm594_vm1 = vcmp.ge.s32.totalorder %v570_v1, 1  ;;  %vm592_vm2 = vcmp.ge.s32.totalorder %v568_v2, 1  ;;  %vm601_vm3 = vcmp.lt.s32.totalorder %v569_v0, 7  ;;  %v567_v7 = vld [vmem:[%s4560_s28] sm:$0xff]  ;;  %v572_v13 = vld [vmem:[%s4560_s28 + $0x28] sm:$0xff]  ;;  %s3645_s20 = scalar_lea.vmem %s4561_s1, %s3071_s30 }
  0x15   : > { %v634_v4 = vsel %vm593_vm0, 1, %v3473_v3  ;;  %v635_v5 = vsel %vm594_vm1, 1, %v3473_v3  ;;  %v633_v6 = vsel %vm592_vm2, 1, %v3473_v3  ;;  %vm600_vm4 = vcmp.lt.s32.totalorder %v568_v2, 7  ;;  %v571_v12 = vld [vmem:[%s4560_s28 + $0x20] sm:$0xff]  ;;  %v573_v15 = vld [vmem:[%s4560_s28 + $0x30] sm:$0xff] }
  0x16   : > { %647 = vperm.xlu1 %3352, %v634_v4   ;;  %644 = vperm.xlu0 %3346, %v633_v6   ;;  %v773_v8 = vsel %vm601_vm3, 1, %v3473_v3  ;;  %v772_v9 = vsel %vm600_vm4, 1, %v3473_v3  ;;  %vm602_vm5 = vcmp.lt.s32.totalorder %v570_v1, 7  ;;  %vm591_vm6 = vcmp.ge.s32.totalorder %v567_v7, 1  ;;  %v574_v18 = vld [vmem:[%s4560_s28 + $0x38] sm:$0xff]  ;;  %v3652_v36 = vld [vmem:[%s3645_s20] sm:$0xff] }
  0x17   : > { %v774_v10 = vsel %vm602_vm5, 1, %v3473_v3  ;;  %v840_v11 = vsel %vm591_vm6, 1, %v3473_v3  ;;  %vm595_vm7 = vcmp.ge.s32.totalorder %v571_v12, 1  ;;  %vm596_vm8 = vcmp.ge.s32.totalorder %v572_v13, 1  ;;  %4562 = vst [vmem:[#allocation2_spill] sm:$0xff] %v3652_v36  ;;  %v3655_v37 = vld [vmem:[%s3645_s20 + $0x38] sm:$0xff] }
  0x18   : > { %v636_v14 = vsel %vm595_vm7, 1, %v3473_v3  ;;  %vm599_vm9 = vcmp.lt.s32.totalorder %v567_v7, 7  ;;  %v637_v16 = vsel %vm596_vm8, 1, %v3473_v3  ;;  %vm597_vm10 = vcmp.ge.s32.totalorder %v573_v15, 1  ;;  %v3660_v39 = vld [vmem:[%s3645_s20 + $0x8] sm:$0xff]  ;;  %v3663_v40 = vld [vmem:[%s3645_s20 + $0x10] sm:$0xff] }
  0x19   : > { %v931_v17 = vsel %vm599_vm9, 1, %v3473_v3  ;;  %v638_v19 = vsel %vm597_vm10, 1, %v3473_v3  ;;  %vm598_vm11 = vcmp.ge.s32.totalorder %v574_v18, 1  ;;  %vm603_vm12 = vcmp.lt.s32.totalorder %v571_v12, 7  ;;  %4563 = vst [vmem:[#allocation3_spill] sm:$0xff] %v3660_v39  ;;  %v3670_v43 = vld [vmem:[%s3645_s20 + $0x30] sm:$0xff] }
  0x1a   : > { %650 = vperm.xlu1 %3352, %v635_v5   ;;  %783 = vperm.xlu0 %3346, %v772_v9   ;;  %v639_v20 = vsel %vm598_vm11, 1, %v3473_v3  ;;  %v775_v21 = vsel %vm603_vm12, 1, %v3473_v3  ;;  %vm604_vm13 = vcmp.lt.s32.totalorder %v572_v13, 7  ;;  %vm605_vm14 = vcmp.lt.s32.totalorder %v573_v15, 7  ;;  %v3677_v48 = vld [vmem:[%s3645_s20 + $0x18] sm:$0xff]  ;;  %v3691_v56 = vld [vmem:[%s3645_s20 + $0x20] sm:$0xff] }
  0x1b   : > { %v776_v22 = vsel %vm604_vm13, 1, %v3473_v3  ;;  %v777_v23 = vsel %vm605_vm14, 1, %v3473_v3  ;;  %vm606_vm15 = vcmp.lt.s32.totalorder %v574_v18, 7  ;;  %v754_v44 = vrot.slane %v3652_v36, 1  ;;  %v3718_v1 = vld [vmem:[%s4531_s2 + $0x5] ss:$0 sm:$0xff] }
  0x1c   : > { %v778_v24 = vsel %vm606_vm15, 1, %v3473_v3  ;;  %v4548_v45 = vrot.slane %v3655_v37, 1  ;;  %v615_v46 = vrot.slane %v3652_v36, 7  ;;  %v616_v47 = vrot.slane %v3660_v39, 7  ;;  %v3721_v2 = vld [vmem:[%s3645_s20 + $0x28] sm:$0xff] }
  0x1d   : > { %vm762_vm0 = vcmp.lt.s32.totalorder %v3657_v38, 7  ;;  %v617_v49 = vrot.slane %v3663_v40, 7  ;;  %v622_v50 = vrot.slane %v3655_v37, 7  ;;  %v755_v53 = vrot.slane %v3660_v39, 1 }
  0x1e   : > { %786 = vperm.xlu1 %3352, %v773_v8   ;;  %789 = vperm.xlu0 %3346, %v774_v10   ;;  %v756_v54 = vrot.slane %v3663_v40, 1  ;;  %v621_v58 = vrot.slane %v3670_v43, 7  ;;  %vm623_vm1 = vcmp.lt.s32.totalorder %v3657_v38, 1  ;;  %v3698_v59 = vmul.f32 %v2987_v52, %v3660_v39 }
  0x1f   : > { %v757_v60 = vrot.slane %v3677_v48, 1  ;;  %v3705_v61 = vsel %vm762_vm0, %v4548_v45, %v754_v44  ;;  %v3709_v62 = vsel %vm623_vm1, %v615_v46, %v616_v47  ;;  %v3712_v63 = vmul.f32 %v2987_v52, %v3663_v40 }
  0x20   : > { %4564 = vst [vmem:[#allocation4_spill] sm:$0xff] %v3705_v61  ;;  %v618_v0 = vrot.slane %v3677_v48, 7  ;;  %v3749_v12 = vsel %vm623_vm1, %v621_v58, %v622_v50  ;;  %v3753_v13 = vsel %vm762_vm0, %v754_v44, %v755_v53  ;;  %v620_v15 = vrot.slane %v3721_v2, 7 }
  0x21   : > { %4568 = vst [vmem:[#allocation6_spill] sm:$0xff] %v3749_v12  ;;  %v3795_v33 = vmul.f32 %v2987_v52, %v3691_v56  ;;  %v3833_v7 = vmul.f32 %v2987_v52, %v3670_v43 }
  0x22   : > { %849 = vperm.xlu1 %3352, %v840_v11   ;;  %852 = vperm.xlu0 %3346, %v633_v6   ;;  %v3767_v18 = vsel %vm623_vm1, %v617_v49, %v618_v0 }
  0x23   : > { %4571 = vst [vmem:[#allocation7_spill] sm:$0xff] %v3833_v7  ;;  %v3869_v7 = vld [vmem:[%s4531_s2 + $0x9] ss:$0 sm:$0xff] }
  0x24   : > { %v3913_v38 = vmul.f32 %v3869_v7, %v3677_v48 }
  0x26   : > { %855 = vperm.xlu1 %3352, %v634_v4   ;;  %858 = vperm.xlu0 %3346, %v635_v5  }
  0x2a   : > { %653 = vperm.xlu1 %3352, %v636_v14   ;;  %656 = vperm.xlu0 %3346, %v637_v16  }
  0x2e   : > { %940 = vperm.xlu1 %3352, %v931_v17   ;;  %943 = vperm.xlu0 %3346, %v772_v9  }
  0x32   : > { %659 = vperm.xlu1 %3352, %v638_v19   ;;  %662 = vperm.xlu0 %3346, %v639_v20  }
  0x36   : > { %946 = vperm.xlu1 %3352, %v773_v8   ;;  %949 = vperm.xlu0 %3346, %v774_v10  }
  0x3a   : > { %792 = vperm.xlu1 %3352, %v775_v21   ;;  %795 = vperm.xlu0 %3346, %v776_v22  }
  0x3e   : > { %1017 = vperm.xlu1 %3352, %v840_v11   ;;  %1020 = vperm.xlu0 %3346, %v633_v6   ;;  %v619_v6 = vrot.slane %v3691_v56, 7  ;;  %v730_v11 = vmul.f32 0.0, %v2987_v52 }
  0x42   : > { %798 = vperm.xlu1 %3352, %v777_v23   ;;  %801 = vperm.xlu0 %3346, %v778_v24  }
  0x46   : > { %1023 = vperm.xlu1 %3352, %v634_v4   ;;  %1026 = vperm.xlu0 %3346, %v635_v5   ;;  %v3729_v4 = vsel %vm623_vm1, %v622_v50, %v615_v46  ;;  %v3732_v5 = vmul.f32 %v2987_v52, %v3652_v36  ;;  %v3809_v50 = vsel %vm623_vm1, %v619_v6, %v620_v15 }
  0x47   : > { %4565 = vst [vmem:[#allocation5_spill] sm:$0xff] %v3729_v4 }
  0x4a   : > { %861 = vperm.xlu1 %3352, %v636_v14   ;;  %864 = vperm.xlu0 %3346, %v637_v16  }
  0x4e   : > { %867 = vperm.xlu1 %3352, %v638_v19   ;;  %870 = vperm.xlu0 %3346, %v639_v20   ;;  %v3775_v20 = vmul.f32 %v3718_v1, %v3663_v40 }
  0x52   : > { %1140 = vperm.xlu1 %3352, %v931_v17   ;;  %1143 = vperm.xlu0 %3346, %v772_v9  }
  0x56   : > { %1146 = vperm.xlu1 %3352, %v773_v8   ;;  %1149 = vperm.xlu0 %3346, %v774_v10   ;;  %v3741_v8 = vsel %vm762_vm0, %v755_v53, %v756_v54 }
  0x5a   : > { %952 = vperm.xlu1 %3352, %v775_v21   ;;  %955 = vperm.xlu0 %3346, %v776_v22  }
  0x5e   : > { %958 = vperm.xlu1 %3352, %v777_v23   ;;  %961 = vperm.xlu0 %3346, %v778_v24   ;;  %v758_v24 = vrot.slane %v3691_v56, 1 }
  0x62   : > { %1029 = vperm.xlu1 %3352, %v636_v14   ;;  %1032 = vperm.xlu0 %3346, %v637_v16   ;;  %v3757_v14 = vsel %vm762_vm0, %v756_v54, %v757_v60  ;;  %v3762_v16 = vmul.f32 %v3718_v1, %v3652_v36  ;;  %v3822_v54 = vsel %vm623_vm1, %v620_v15, %v621_v58  ;;  %v3845_v15 = vld [vmem:[%s4531_s2 + $0x4] ss:$0 sm:$0xff] }
  0x66   : > { %1035 = vperm.xlu1 %3352, %v638_v19   ;;  %1038 = vperm.xlu0 %3346, %v3473_v3   ;;  %v3771_v19 = vmul.f32 %v3718_v1, %v3660_v39 }
  0x6a   : > { %1152 = vperm.xlu1 %3352, %v775_v21   ;;  %1155 = vperm.xlu0 %3346, %v776_v22   ;;  %v3780_v21 = vld [vmem:[%s4531_s2] ss:$0 sm:$0xff]  ;;  %v3783_v22 = vmul.f32 %v2987_v52, %v3677_v48 }
  0x6e   : > { %1158 = vperm.xlu1 %3352, %v777_v23   ;;  %1161 = vperm.xlu0 %3346, %v3473_v3   ;;  %v3725_v3 = vsel %vm623_vm1, %v616_v47, %v617_v49  ;;  %v3787_v23 = vsel %vm623_vm1, %v618_v0, %v619_v6  ;;  %v3803_v47 = vmul.f32 %v3718_v1, %v3677_v48  ;;  %v759_v49 = vrot.slane %v3721_v2, 1  ;;  %v3828_v0 = vld [vmem:[%s4531_s2 + $0x2] ss:$0 sm:$0xff] }
  0x8a   : > { %v3617_v25 = vpop.permute.xlu0 %3348 }
  0x8b   : > { %v3350_v51 = vunpack.i.l.bf16 %v3617_v25  ;;  %v3351_v17 = vunpack.i.h.bf16 %v3617_v25 }
  0x8d   : > { %vm3735_vm2 = vcmp.eq.s32.totalorder %v3350_v51, 1  ;;  %v760_v51 = vrot.slane %v3670_v43, 1  ;;  %vm3815_vm5 = vcmp.eq.s32.totalorder %v3351_v17, 1  ;;  %v3837_v17 = vsel %vm762_vm0, %v757_v60, %v758_v24 }
  0x8e   : > { %v672_v25 = vsel %vm3735_vm2, %v3749_v12, 0.0  ;;  %v811_v60 = vsel %vm3815_vm5, %v3705_v61, 0.0 }
  0x8f   : > { %v3864_v36 = vsel %vm762_vm0, %v759_v49, %v760_v51 }
  0x90   : > { %4573 = vst [vmem:[#allocation9_spill] sm:$0xff] %v3864_v36 }
  0x91   : > { %v3619_v26 = vpop.permute.xlu1 %647  ;;  %v3623_v28 = vpop.permute.xlu0 %644 }
  0x92   : > { %vm666_vm3 = vcmp.eq.s32.totalorder %v3619_v26, 1  ;;  %vm665_vm4 = vcmp.eq.s32.totalorder %v3623_v28, 1  ;;  %v3812_v26 = vmul.f32 %v2987_v52, %v3721_v2  ;;  %v685_v28 = vmul.f32 %v3780_v21, %v672_v25 }
  0x93   : > { %v674_v6 = vsel %vm666_vm3, %v3709_v62, 0.0  ;;  %v673_v58 = vsel %vm665_vm4, %v3729_v4, 0.0  ;;  %v3853_v52 = vsel %vm762_vm0, %v758_v24, %v759_v49 }
  0x94   : > { %4572 = vst [vmem:[#allocation8_spill] sm:$0xff] %v3853_v52  ;;  %v687_v24 = vmul.f32 %v3780_v21, %v674_v6  ;;  %v686_v49 = vmul.f32 %v3780_v21, %v673_v58  ;;  %v824_v6 = vmul.f32 %v3828_v0, %v811_v60  ;;  %v4576_v58 = vrot.slane %v3655_v37, 1 }
  0x95   : > { %v3621_v27 = vpop.permute.xlu1 %650  ;;  %v3629_v30 = vpop.permute.xlu0 %783 }
  0x96   : > { %vm804_vm7 = vcmp.eq.s32.totalorder %v3629_v30, 1  ;;  %vm667_vm8 = vcmp.eq.s32.totalorder %v3621_v27, 1  ;;  %v3891_v27 = vmul.f32 %v3869_v7, %v3660_v39 }
  0x97   : > { %v812_v53 = vsel %vm804_vm7, %v3753_v13, 0.0 }
  0x98   : > { %4575 = vst [vmem:[#allocation11_spill] sm:$0xff] %v3891_v27  ;;  %v739_v27 = vadd.f32 %v3732_v5, %v686_v49  ;;  %v3927_v5 = vmul.f32 %v3718_v1, %v3691_v56 }
  0x99   : > { %v3627_v29 = vpop.permute.xlu1 %786  ;;  %v3635_v31 = vpop.permute.xlu0 %789 }
  0x9a   : > { %vm805_vm9 = vcmp.eq.s32.totalorder %v3627_v29, 1  ;;  %vm806_vm11 = vcmp.eq.s32.totalorder %v3635_v31, 1 }
  0x9b   : > { %v814_v29 = vsel %vm806_vm11, %v3757_v14, 0.0 }
  0x9d   : > { %v3637_v32 = vpop.permute.xlu1 %849  ;;  %v3647_v34 = vpop.permute.xlu0 %852 }
  0x9e   : > { %vm872_vm6 = vcmp.eq.s32.totalorder %v3637_v32, 1  ;;  %vm873_vm10 = vcmp.eq.s32.totalorder %v3647_v34, 1  ;;  %v738_v32 = vadd.f32 %v730_v11, %v685_v28  ;;  %v675_v34 = vsel %vm667_vm8, %v3725_v3, 0.0 }
  0x9f   : > { %v880_v12 = vsel %vm872_vm6, %v3729_v4, 0.0  ;;  %v813_v4 = vsel %vm805_vm9, %v3741_v8, 0.0  ;;  %v881_v61 = vsel %vm873_vm10, %v3709_v62, 0.0  ;;  %v825_v28 = vmul.f32 %v3828_v0, %v812_v53 }
  0xa0   : > { %v894_v30 = vmul.f32 %v3845_v15, %v880_v12  ;;  %v3903_v12 = vmul.f32 %v3869_v7, %v3663_v40  ;;  %v688_v60 = vmul.f32 %v3780_v21, %v675_v34  ;;  %v826_v36 = vmul.f32 %v3828_v0, %v813_v4 }
  0xa1   : > { %v3649_v35 = vpop.permute.xlu1 %855  ;;  %v3665_v41 = vpop.permute.xlu0 %858  ;;  %v832_v52 = vadd.f32 %v824_v6, %v738_v32  ;;  %v740_v53 = vadd.f32 %v3698_v59, %v687_v24  ;;  %v833_v6 = vadd.f32 %v825_v28, %v739_v27 }
  0xa2   : > { %vm874_vm12 = vcmp.eq.s32.totalorder %v3649_v35, 1  ;;  %v3899_v35 = vsel %vm762_vm0, %v760_v51, %v4576_v58  ;;  %v827_v51 = vmul.f32 %v3828_v0, %v814_v29  ;;  %vm875_vm13 = vcmp.eq.s32.totalorder %v3665_v41, 1 }
  0xa3   : > { %v882_v39 = vsel %vm874_vm12, %v3725_v3, 0.0  ;;  %v902_v32 = vadd.f32 %v894_v30, %v832_v52  ;;  %v741_v24 = vadd.f32 %v3712_v63, %v688_v60  ;;  %v834_v41 = vadd.f32 %v826_v36, %v740_v53  ;;  %v3965_v60 = vld [vmem:[%s4531_s2 + $0x8] ss:$0 sm:$0xff] }
  0xa4   : > { %v896_v59 = vmul.f32 %v3845_v15, %v882_v39  ;;  %v3936_v52 = vmul.f32 %v3718_v1, %v3670_v43  ;;  %v883_v49 = vsel %vm875_vm13, %v3767_v18, 0.0 }
  0xa5   : > { %v3667_v42 = vpop.permute.xlu1 %653  ;;  %v3688_v55 = vpop.permute.xlu0 %656  ;;  %v835_v27 = vadd.f32 %v827_v51, %v741_v24  ;;  %v923_v28 = vadd.f32 %v3762_v16, %v902_v32 }
  0xa6   : > { %vm668_vm14 = vcmp.eq.s32.totalorder %v3667_v42, 1  ;;  %v3932_v42 = vmul.f32 %v3718_v1, %v3721_v2  ;;  %vm669_vm0 = vcmp.eq.s32.totalorder %v3688_v55, 1  ;;  %v904_v29 = vadd.f32 %v896_v59, %v834_v41  ;;  %v3953_v55 = vld [vmem:[%s4531_s2 + $0x6] ss:$0 sm:$0xff] }
  0xa7   : > { %v676_v30 = vsel %vm668_vm14, %v3767_v18, 0.0  ;;  %v677_v16 = vsel %vm669_vm0, %v3787_v23, 0.0  ;;  %vm1223_vm14 = vcmask 64512  }
  0xa9   : > { %v3693_v57 = vpop.permute.xlu1 %940  ;;  %v3743_v9 = vpop.permute.xlu0 %943 }
  0xaa   : > { %vm963_vm15 = vcmp.eq.s32.totalorder %v3693_v57, 1  ;;  %vm964_vm1 = vcmp.eq.s32.totalorder %v3743_v9, 1  ;;  %v689_v57 = vmul.f32 %v3780_v21, %v676_v30 }
  0xab   : > { %v971_v9 = vsel %vm963_vm15, %v3753_v13, 0.0 }
  0xad   : > { %v3745_v10 = vpop.permute.xlu1 %659  ;;  %v3797_v44 = vpop.permute.xlu0 %662 }
  0xae   : > { %vm670_vm2 = vcmp.eq.s32.totalorder %v3745_v10, 1  ;;  %v972_v10 = vsel %vm964_vm1, %v3741_v8, 0.0  ;;  %vm671_vm6 = vcmp.eq.s32.totalorder %v3797_v44, 1 }
  0xaf   : > { %v985_v59 = vmul.f32 %v3953_v55, %v972_v10  ;;  %v679_v24 = vsel %vm671_vm6, %v3822_v54, 0.0 }
  0xb1   : > { %v3799_v46 = vpop.permute.xlu1 %946  ;;  %v3847_v25 = vpop.permute.xlu0 %949 }
  0xb2   : > { %vm965_vm3 = vcmp.eq.s32.totalorder %v3799_v46, 1  ;;  %v678_v46 = vsel %vm670_vm2, %v3809_v50, 0.0  ;;  %vm966_vm8 = vcmp.eq.s32.totalorder %v3847_v25, 1 }
  0xb3   : > { %v974_v25 = vsel %vm966_vm8, %v3837_v17, 0.0 }
  0xb5   : > { %v3849_v45 = vpop.permute.xlu1 %792  ;;  %v3887_v31 = vpop.permute.xlu0 %795 }
  0xb6   : > { %4574 = vst [vmem:[#allocation10_spill] sm:$0xff] %v3887_v31  ;;  %v895_v31 = vmul.f32 %v3845_v15, %v881_v61  ;;  %v3923_v61 = vmul.f32 %v3869_v7, %v3691_v56  ;;  %vm807_vm9 = vcmp.eq.s32.totalorder %v3849_v45, 1 }
  0xb7   : > { %v815_v45 = vsel %vm807_vm9, %v3837_v17, 0.0 }
  0xb8   : > { %v903_v39 = vadd.f32 %v895_v31, %v833_v6  ;;  %v897_v31 = vmul.f32 %v3845_v15, %v883_v49  ;;  %v690_v6 = vmul.f32 %v3780_v21, %v677_v16  ;;  %v3990_v16 = vmul.f32 %v3718_v1, %v3655_v37 }
  0xb9   : > { %v1018_v11 = vpop.permute.xlu1 %1017  ;;  %v1021_v4 = vpop.permute.xlu0 %1020 }
  0xba   : > { %vm1040_vm4 = vcmp.eq.s32.totalorder %v1018_v11, 1  ;;  %vm1041_vm5 = vcmp.eq.s32.totalorder %v1021_v4, 1  ;;  %v924_v58 = vadd.f32 %v3771_v19, %v903_v39  ;;  %v973_v11 = vsel %vm965_vm3, %v3757_v14, 0.0 }
  0xbb   : > { %v1048_v53 = vsel %vm1040_vm4, %v3709_v62, 0.0  ;;  %v984_v19 = vmul.f32 %v3953_v55, %v971_v9  ;;  %v1049_v44 = vsel %vm1041_vm5, %v3725_v3, 0.0  ;;  %v905_v32 = vadd.f32 %v897_v31, %v835_v27 }
  0xbc   : > { %v691_v62 = vmul.f32 %v3780_v21, %v678_v46  ;;  %v986_v41 = vmul.f32 %v3953_v55, %v973_v11  ;;  %v1062_v39 = vmul.f32 %v3965_v60, %v1048_v53  ;;  %v1063_v3 = vmul.f32 %v3965_v60, %v1049_v44 }
  0xbd   : > { %v3918_v34 = vpop.permute.xlu1 %798  ;;  %v3943_v36 = vpop.permute.xlu0 %801  ;;  %v925_v31 = vadd.f32 %v3775_v20, %v904_v29  ;;  %v992_v9 = vadd.f32 %v984_v19, %v923_v28  ;;  %v993_v10 = vadd.f32 %v985_v59, %v924_v58  ;;  %v926_v46 = vadd.f32 %v3803_v47, %v905_v32  ;;  %v4009_v47 = vld [vmem:[%s4531_s2 + $0xa] ss:$0 sm:$0xff]  ;;  %v4578_v32 = vld [vmem:[#allocation10_spill] sm:$0xff] }
  0xbe   : > { %v987_v53 = vmul.f32 %v3953_v55, %v974_v25  ;;  %v3999_v20 = vadd.f32 %v3795_v33, %v690_v6  ;;  %v4002_v1 = vadd.f32 %v3812_v26, %v691_v62  ;;  %v4577_v58 = vld [vmem:[#allocation7_spill] sm:$0xff]  ;;  %vm808_vm11 = vcmp.eq.s32.totalorder %v4578_v32, 1 }
  0xbf   : > { %v1070_v44 = vadd.f32 %v1062_v39, %v992_v9  ;;  %v994_v28 = vadd.f32 %v986_v41, %v925_v31  ;;  %vm809_vm12 = vcmp.eq.s32.totalorder %v3918_v34, 1  ;;  %v4579_v62 = vld [vmem:[#allocation11_spill] sm:$0xff]  ;;  %vm810_vm0 = vcmp.eq.s32.totalorder %v3943_v36, 1 }
  0xc0   : > { %v995_v59 = vadd.f32 %v987_v53, %v926_v46  ;;  %v4583_v36 = vld [vmem:[#allocation3_spill] sm:$0xff] }
  0xc1   : > { %v1024_v63 = vpop.permute.xlu1 %1023  ;;  %v1027_v51 = vpop.permute.xlu0 %1026  ;;  %v1115_v41 = vadd.f32 %v4579_v62, %v1070_v44 }
  0xc2   : > { %vm1042_vm7 = vcmp.eq.s32.totalorder %v1024_v63, 1  ;;  %vm1043_vm10 = vcmp.eq.s32.totalorder %v1027_v51, 1  ;;  %v692_v63 = vmul.f32 %v3780_v21, %v679_v24  ;;  %v828_v51 = vmul.f32 %v3828_v0, %v815_v45  ;;  %v4581_v45 = vld [vmem:[#allocation9_spill] sm:$0xff] }
  0xc3   : > { %v1050_v49 = vsel %vm1042_vm7, %v3767_v18, 0.0  ;;  %v742_v18 = vadd.f32 %v3783_v22, %v689_v57  ;;  %v1051_v21 = vsel %vm1043_vm10, %v3787_v23, 0.0  ;;  %v1071_v22 = vadd.f32 %v1063_v3, %v993_v10 }
  0xc4   : > { %v1064_v11 = vmul.f32 %v3965_v60, %v1050_v49  ;;  %v4012_v19 = vadd.f32 %v4577_v58, %v692_v63  ;;  %v1065_v26 = vmul.f32 %v3965_v60, %v1051_v21  ;;  %v4580_v49 = vld [vmem:[#allocation8_spill] sm:$0xff]  ;;  %v817_v3 = vsel %vm809_vm12, %v4581_v45, 0.0 }
  0xc5   : > { %v862_v4 = vpop.permute.xlu1 %861  ;;  %v3982_v30 = vpop.permute.xlu0 %864  ;;  %v836_v24 = vadd.f32 %v828_v51, %v742_v18  ;;  %v816_v25 = vsel %vm808_vm11, %v4580_v49, 0.0  ;;  %v1116_v63 = vadd.f32 %v3903_v12, %v1071_v22 }
  0xc6   : > { %v1072_v33 = vadd.f32 %v1064_v11, %v994_v28  ;;  %vm876_vm15 = vcmp.eq.s32.totalorder %v862_v4, 1  ;;  %vm877_vm3 = vcmp.eq.s32.totalorder %v3982_v30, 1  ;;  %v4582_v11 = vld [vmem:[#allocation2_spill] sm:$0xff]  ;;  %v829_v21 = vmul.f32 %v3828_v0, %v816_v25 }
  0xc7   : > { %v884_v4 = vsel %vm876_vm15, %v3787_v23, 0.0  ;;  %v4035_v23 = vld [vmem:[%s4532_s3] ss:$0 sm:$0xff] }
  0xc8   : > { %v1117_v10 = vadd.f32 %v3913_v38, %v1072_v33  ;;  %v898_v38 = vmul.f32 %v3845_v15, %v884_v4 }
  0xc9   : > { %v3984_v27 = vpop.permute.xlu1 %867  ;;  %v4004_v29 = vpop.permute.xlu0 %870 }
  0xca   : > { %vm878_vm4 = vcmp.eq.s32.totalorder %v3984_v27, 1  ;;  %vm879_vm7 = vcmp.eq.s32.totalorder %v4004_v29, 1  ;;  %v906_v27 = vadd.f32 %v898_v38, %v836_v24  ;;  %v4584_v24 = vld [vmem:[#allocation6_spill] sm:$0xff] }
  0xcb   : > { %v887_v4 = vsel %vm879_vm7, %v4584_v24, 0.0  ;;  %vm2366_vm7 = vcmask 1041408  }
  0xcd   : > { %v1141_v57 = vpop.permute.xlu1 %1140  ;;  %v1144_v34 = vpop.permute.xlu0 %1143 }
  0xce   : > { %vm1163_vm13 = vcmp.eq.s32.totalorder %v1141_v57, 1  ;;  %vm1164_vm1 = vcmp.eq.s32.totalorder %v1144_v34, 1  ;;  %v885_v57 = vsel %vm877_vm3, %v3809_v50, 0.0 }
  0xcf   : > { %v1171_v6 = vsel %vm1163_vm13, %v3741_v8, 0.0  ;;  %v1073_v8 = vadd.f32 %v1065_v26, %v995_v59  ;;  %v1172_v18 = vsel %vm1164_vm1, %v3757_v14, 0.0  ;;  %v830_v14 = vmul.f32 %v3828_v0, %v817_v3 }
  0xd0   : > { %v1184_v39 = vmul.f32 %v4009_v47, %v1171_v6  ;;  %v1185_v51 = vmul.f32 %v4009_v47, %v1172_v18  ;;  %v886_v59 = vsel %vm878_vm4, %v3822_v54, 0.0  ;;  %v837_v3 = vadd.f32 %v829_v21, %v3999_v20 }
  0xd1   : > { %v1147_v31 = vpop.permute.xlu1 %1146  ;;  %v1150_v30 = vpop.permute.xlu0 %1149  ;;  %v1118_v26 = vadd.f32 %v3923_v61, %v1073_v8  ;;  %v899_v34 = vmul.f32 %v3845_v15, %v885_v57  ;;  %v838_v61 = vadd.f32 %v830_v14, %v4002_v1  ;;  %v900_v20 = vmul.f32 %v3845_v15, %v886_v59 }
  0xd2   : > { %v1192_v9 = vadd.f32 %v1184_v39, %v1115_v41  ;;  %vm1165_vm2 = vcmp.eq.s32.totalorder %v1147_v31, 1  ;;  %v1193_v28 = vadd.f32 %v1185_v51, %v1116_v63  ;;  %vm1166_vm5 = vcmp.eq.s32.totalorder %v1150_v30, 1 }
  0xd3   : > { %v1173_v46 = vsel %vm1165_vm2, %v3837_v17, 0.0  ;;  %v818_v17 = vsel %vm810_vm0, %v3899_v35, 0.0  ;;  %v1174_v58 = vsel %vm1166_vm5, %v4580_v49, 0.0  ;;  %v908_v21 = vadd.f32 %v900_v20, %v838_v61 }
  0xd4   : > { %v1200_v53 = vadd.f32 %v1192_v9, %v4582_v11  ;;  %v1186_v12 = vmul.f32 %v4009_v47, %v1173_v46  ;;  %v1201_v33 = vadd.f32 %v1193_v28, %v4583_v36  ;;  %v1187_v6 = vmul.f32 %v4009_v47, %v1174_v58 }
  0xd5   : > { %v953_v44 = vpop.permute.xlu1 %952  ;;  %v956_v41 = vpop.permute.xlu0 %955  ;;  %v831_v9 = vmul.f32 %v3828_v0, %v818_v17  ;;  %v907_v11 = vadd.f32 %v899_v34, %v837_v3  ;;  %v901_v0 = vmul.f32 %v3845_v15, %v887_v4  ;;  %v1111_v15 = vmul.f32 %v3869_v7, %v3721_v2 }
  0xd6   : > { %v1194_v22 = vadd.f32 %v1186_v12, %v1117_v10  ;;  %vm967_vm6 = vcmp.eq.s32.totalorder %v953_v44, 1  ;;  %v4047_v32 = vadd.f32 %v4035_v23, %v1200_v53  ;;  %v1195_v63 = vadd.f32 %v1187_v6, %v1118_v26 }
  0xd7   : > { %v975_v31 = vsel %vm967_vm6, %v4580_v49, 0.0  ;;  %vm968_vm8 = vcmp.eq.s32.totalorder %v956_v41, 1  ;;  %v927_v49 = vadd.f32 %v3927_v5, %v906_v27  ;;  %v839_v12 = vadd.f32 %v831_v9, %v4012_v19  ;;  %v4585_v19 = vld [vmem:[#allocation4_spill] sm:$0xff] }
  0xd8   : > { %v1202_v62 = vadd.f32 %v1194_v22, %v3663_v40  ;;  %v1224_v25 = vsel %vm1223_vm14, %v4047_v32, 0.0  ;;  %v4065_v40 = vadd.f32 %v4035_v23, %v1201_v33  ;;  %v1203_v8 = vadd.f32 %v1195_v63, %v3677_v48 }
  0xd9   : > { %v959_v39 = vpop.permute.xlu1 %958  ;;  %1225 = vadd.xlane.f32.xlu1 %v1224_v25  ;;  %v988_v18 = vmul.f32 %v3953_v55, %v975_v31  ;;  %v962_v1 = vpop.permute.xlu0 %961  ;;  %v976_v53 = vsel %vm968_vm8, %v4581_v45, 0.0  ;;  %v909_v58 = vadd.f32 %v901_v0, %v839_v12  ;;  %v928_v36 = vadd.f32 %v3932_v42, %v907_v11  ;;  %v4586_v31 = vld [vmem:[#allocation5_spill] sm:$0xff] }
  0xda   : > { %vm969_vm9 = vcmp.eq.s32.totalorder %v959_v39, 1  ;;  %v1227_v29 = vsel %vm1223_vm14, %v4065_v40, 0.0  ;;  %v4075_v46 = vadd.f32 %v4035_v23, %v1202_v62  ;;  %vm970_vm11 = vcmp.eq.s32.totalorder %v962_v1, 1 }
  0xdb   : > { %1228 = vadd.xlane.f32.xlu0 %v1227_v29  ;;  %v977_v48 = vsel %vm969_vm9, %v3899_v35, 0.0  ;;  %v4082_v51 = vadd.f32 %v4035_v23, %v1203_v8  ;;  %v996_v17 = vadd.f32 %v988_v18, %v927_v49  ;;  %v989_v38 = vmul.f32 %v3953_v55, %v976_v53 }
  0xdc   : > { %v990_v22 = vmul.f32 %v3953_v55, %v977_v48  ;;  %v978_v57 = vsel %vm970_vm11, %v4585_v19, 0.0  ;;  %v929_v6 = vadd.f32 %v3936_v52, %v908_v21  ;;  %v1112_v34 = vmul.f32 %v3869_v7, %v3670_v43 }
  0xdd   : > { %v1030_v10 = vpop.permute.xlu1 %1029  ;;  %v1033_v30 = vpop.permute.xlu0 %1032  ;;  %v1233_v28 = vsel %vm1223_vm14, %v4082_v51, 0.0  ;;  %v997_v41 = vadd.f32 %v989_v38, %v928_v36  ;;  %v991_v39 = vmul.f32 %v3953_v55, %v978_v57  ;;  %v930_v52 = vadd.f32 %v3990_v16, %v909_v58 }
  0xde   : > { %vm1044_vm10 = vcmp.eq.s32.totalorder %v1030_v10, 1  ;;  %vm1045_vm12 = vcmp.eq.s32.totalorder %v1033_v30, 1  ;;  %1234 = vadd.xlane.f32.xlu1 %v1233_v28  ;;  %v998_v42 = vadd.f32 %v990_v22, %v929_v6  ;;  %v1114_v10 = vmul.f32 0.0, %v3869_v7 }
  0xdf   : > { %v1052_v5 = vsel %vm1044_vm10, %v3809_v50, 0.0  ;;  %v1230_v50 = vsel %vm1223_vm14, %v4075_v46, 0.0  ;;  %v1053_v33 = vsel %vm1045_vm12, %v3822_v54, 0.0  ;;  %v1113_v54 = vmul.f32 %v3869_v7, %v3655_v37 }
  0xe0   : > { %v1066_v14 = vmul.f32 %v3965_v60, %v1052_v5  ;;  %1231 = vadd.xlane.f32.xlu0 %v1230_v50  ;;  %v1067_v59 = vmul.f32 %v3965_v60, %v1053_v33  ;;  %v999_v8 = vadd.f32 %v991_v39, %v930_v52  ;;  %vm1377_vm4 = vcmask 1043456  }
  0xe1   : > { %v1036_v44 = vpop.permute.xlu1 %1035  ;;  %v1039_v25 = vpop.permute.xlu0 %1038  ;;  %vm1594_vm5 = vcmask 31744   ;;  %vm1684_vm6 = vcmask 523264  }
  0xe2   : > { %vm1046_vm13 = vcmp.eq.s32.totalorder %v1036_v44, 1  ;;  %v1074_v27 = vadd.f32 %v1066_v14, %v996_v17  ;;  %vm1047_vm15 = vcmp.eq.s32.totalorder %v1039_v25, 1  ;;  %v1075_v63 = vadd.f32 %v1067_v59, %v997_v41 }
  0xe3   : > { %v1054_v26 = vsel %vm1046_vm13, %v4584_v24, 0.0  ;;  %v1055_v61 = vsel %vm1047_vm15, %v4586_v31, 0.0 }
  0xe4   : > { %v1068_v62 = vmul.f32 %v3965_v60, %v1054_v26  ;;  %v1069_v55 = vmul.f32 %v3965_v60, %v1055_v61  ;;  %v1119_v9 = vadd.f32 %v1111_v15, %v1074_v27  ;;  %v1120_v29 = vadd.f32 %v1112_v34, %v1075_v63 }
  0xe5   : > { %v1153_v3 = vpop.permute.xlu1 %1152  ;;  %v1156_v49 = vpop.permute.xlu0 %1155 }
  0xe6   : > { %vm1167_vm0 = vcmp.eq.s32.totalorder %v1153_v3, 1  ;;  %v1076_v4 = vadd.f32 %v1068_v62, %v998_v42  ;;  %vm1168_vm1 = vcmp.eq.s32.totalorder %v1156_v49, 1  ;;  %v1077_v16 = vadd.f32 %v1069_v55, %v999_v8 }
  0xe7   : > { %v1175_v24 = vsel %vm1167_vm0, %v4581_v45, 0.0  ;;  %v1176_v11 = vsel %vm1168_vm1, %v3899_v35, 0.0 }
  0xe8   : > { %v1188_v20 = vmul.f32 %v4009_v47, %v1175_v24  ;;  %v1189_v60 = vmul.f32 %v4009_v47, %v1176_v11  ;;  %v1121_v53 = vadd.f32 %v1113_v54, %v1076_v4  ;;  %v1122_v7 = vadd.f32 %v1114_v10, %v1077_v16 }
  0xe9   : > { %v1159_v18 = vpop.permute.xlu1 %1158  ;;  %v1162_v5 = vpop.permute.xlu0 %1161 }
  0xea   : > { %v1196_v1 = vadd.f32 %v1188_v20, %v1119_v9  ;;  %vm1169_vm2 = vcmp.eq.s32.totalorder %v1159_v18, 1  ;;  %v1197_v12 = vadd.f32 %v1189_v60, %v1120_v29  ;;  %vm1170_vm3 = vcmp.eq.s32.totalorder %v1162_v5, 1 }
  0xeb   : > { %v1177_v45 = vsel %vm1169_vm2, %v4585_v19, 0.0  ;;  %v1178_v15 = vsel %vm1170_vm3, %v3753_v13, 0.0 }
  0xec   : > { %v1204_v0 = vadd.f32 %v1196_v1, %v3691_v56  ;;  %v1190_v48 = vmul.f32 %v4009_v47, %v1177_v45  ;;  %v1205_v35 = vadd.f32 %v1197_v12, %v3721_v2  ;;  %v1191_v56 = vmul.f32 %v4009_v47, %v1178_v15  ;;  %v1516_v15 = vld [vmem:[%s4537_s8] sm:$0xff] }
  0xee   : > { %v1198_v21 = vadd.f32 %v1190_v48, %v1121_v53  ;;  %v4118_v14 = vadd.f32 %v4035_v23, %v1204_v0  ;;  %v1199_v30 = vadd.f32 %v1191_v56, %v1122_v7  ;;  %v4127_v44 = vadd.f32 %v4035_v23, %v1205_v35  ;;  %v1359_v53 = vld [vmem:[%s4535_s6] sm:$0xff] }
  0xef   : > { %v1446_v48 = vld [vmem:[%s4536_s7] sm:$0xff]  ;;  %v1364_v5 = vpack.c.bf16 %v1359_v53, %v1359_v53  ;;  %v1517_v35 = vpack.c.bf16 %v1516_v15, %v1516_v15 }
  0xf0   : > { %v1206_v17 = vadd.f32 %v1198_v21, %v3670_v43  ;;  %v1236_v38 = vsel %vm1223_vm14, %v4118_v14, 0.0  ;;  %v1207_v50 = vadd.f32 %v1199_v30, %v3655_v37  ;;  %v1239_v2 = vsel %vm1223_vm14, %v4127_v44, 0.0 }
  0xf1   : > { %1237 = vadd.xlane.f32.xlu0 %v1236_v38  ;;  %1240 = vadd.xlane.f32.xlu1 %v1239_v2  ;;  %v1447_v12 = vpack.c.bf16 %v1446_v48, %v1446_v48  ;;  %v1379_v21 = vsel %vm1377_vm4, %v1364_v5, 0  ;;  %v1519_v53 = vsel %vm1377_vm4, %v1517_v35, 0 }
  0xf2   : > { %v4130_v28 = vadd.f32 %v4035_v23, %v1206_v17  ;;  %v4138_v13 = vadd.f32 %v4035_v23, %v1207_v50  ;;  %3319 = vmatprep.subr.msk.bf16.mxu0 %vm1377_vm4, %v1364_v5 }
  0xf3   : > { %3320 = vmatprep.subr.msk.bf16.mxu1 %vm1377_vm4, %v1447_v12  ;;  %v1449_v7 = vsel %vm1377_vm4, %v1447_v12, 0  ;;  %3156 = vmatpush3.bf16.msra.mxu0 %v1379_v21 }
  0xf4   : > { %v1242_v43 = vsel %vm1223_vm14, %v4130_v28, 0.0  ;;  %v1245_v47 = vsel %vm1223_vm14, %v4138_v13, 0.0  ;;  %3166 = vmatpush3.bf16.msra.mxu1 %v1449_v7  ;;  %3321 = vmatprep.subr.msk.bf16.mxu0 %vm1377_vm4, %v1517_v35 }
  0xf5   : > { %1243 = vadd.xlane.f32.xlu0 %v1242_v43  ;;  %1246 = vadd.xlane.f32.xlu1 %v1245_v47 }
 0x162   : > { %v1226_v22 = vpop.xlane.xlu1 %1225 }
 0x163   : > { %v1249_v19 = vmul.f32 0.125, %v1226_v22 }
 0x164   : > { %v1229_v37 = vpop.xlane.xlu0 %1228 }
 0x165   : > { %v4143_v57 = vsub.f32 %v4047_v32, %v1249_v19  ;;  %v1250_v58 = vmul.f32 0.125, %v1229_v37 }
 0x167   : > { %v1265_v36 = vmul.f32 %v4143_v57, %v4143_v57  ;;  %v4148_v33 = vsub.f32 %v4065_v40, %v1250_v58  ;;  %v1235_v26 = vpop.xlane.xlu1 %1234 }
 0x168   : > { %v1252_v27 = vmul.f32 0.125, %v1235_v26  ;;  %v3002_v26 = vld [vmem:[%s4533_s4] ss:$0 sm:$0xff] }
 0x169   : > { %v1273_v23 = vsel %vm1223_vm14, %v1265_v36, 0.0  ;;  %v1232_v6 = vpop.xlane.xlu0 %1231  ;;  %v1266_v62 = vmul.f32 %v4148_v33, %v4148_v33 }
 0x16a   : > { %1274 = vadd.xlane.f32.xlu0 %v1273_v23  ;;  %v1251_v59 = vmul.f32 0.125, %v1232_v6  ;;  %v4154_v41 = vsub.f32 %v4082_v51, %v1252_v27 }
 0x16b   : > { %v1276_v25 = vsel %vm1223_vm14, %v1266_v62, 0.0 }
 0x16c   : > { %v4157_v39 = vsub.f32 %v4075_v46, %v1251_v59  ;;  %1277 = vadd.xlane.f32.xlu1 %v1276_v25  ;;  %v1268_v3 = vmul.f32 %v4154_v41, %v4154_v41 }
 0x16e   : > { %v1267_v34 = vmul.f32 %v4157_v39, %v4157_v39  ;;  %v1282_v42 = vsel %vm1223_vm14, %v1268_v3, 0.0  ;;  %v3003_v3 = vld [vmem:[%s4534_s5] ss:$0 sm:$0xff] }
 0x170   : > { %v1279_v54 = vsel %vm1223_vm14, %v1267_v34, 0.0  ;;  %1283 = vadd.xlane.f32.xlu1 %v1282_v42 }
 0x171   : > { %1280 = vadd.xlane.f32.xlu0 %v1279_v54 }
 0x17a   : > { %v1238_v52 = vpop.xlane.xlu0 %1237  ;;  %v1241_v61 = vpop.xlane.xlu1 %1240 }
 0x17b   : > { %v1253_v63 = vmul.f32 0.125, %v1238_v52  ;;  %v1254_v4 = vmul.f32 0.125, %v1241_v61 }
 0x17d   : > { %v4167_v31 = vsub.f32 %v4118_v14, %v1253_v63  ;;  %v4172_v20 = vsub.f32 %v4127_v44, %v1254_v4 }
 0x17e   : > { %v1244_v24 = vpop.xlane.xlu0 %1243  ;;  %v1247_v18 = vpop.xlane.xlu1 %1246 }
 0x17f   : > { %v1255_v55 = vmul.f32 0.125, %v1244_v24  ;;  %v1269_v9 = vmul.f32 %v4167_v31, %v4167_v31  ;;  %v1256_v1 = vmul.f32 0.125, %v1247_v18  ;;  %v1270_v10 = vmul.f32 %v4172_v20, %v4172_v20 }
 0x181   : > { %v4175_v8 = vsub.f32 %v4130_v28, %v1255_v55  ;;  %v1285_v49 = vsel %vm1223_vm14, %v1269_v9, 0.0  ;;  %v4183_v29 = vsub.f32 %v4138_v13, %v1256_v1  ;;  %v1288_v11 = vsel %vm1223_vm14, %v1270_v10, 0.0 }
 0x182   : > { %1286 = vadd.xlane.f32.xlu0 %v1285_v49  ;;  %1289 = vadd.xlane.f32.xlu1 %v1288_v11 }
 0x183   : > { %v1271_v16 = vmul.f32 %v4175_v8, %v4175_v8  ;;  %v1272_v0 = vmul.f32 %v4183_v29, %v4183_v29 }
 0x185   : > { %v1291_v45 = vsel %vm1223_vm14, %v1271_v16, 0.0  ;;  %v1294_v60 = vsel %vm1223_vm14, %v1272_v0, 0.0 }
 0x186   : > { %1292 = vadd.xlane.f32.xlu0 %v1291_v45  ;;  %1295 = vadd.xlane.f32.xlu1 %v1294_v60 }
 0x1f3   : > { %v1275_v17 = vpop.xlane.xlu0 %1274 }
 0x1f4   : > { %v1297_v56 = vmul.f32 0.125, %v1275_v17 }
 0x1f5   : > { %v1278_v30 = vpop.xlane.xlu1 %1277 }
 0x1f6   : > { %v1305_v38 = vadd.f32 1e-05, %v1297_v56  ;;  %v1298_v50 = vmul.f32 0.125, %v1278_v30 }
 0x1f8   : > { %3353 = vrsqrt.f32 %v1305_v38  ;;  %v1306_v2 = vadd.f32 1e-05, %v1298_v50 }
 0x1f9   : > { %v1284_v43 = vpop.xlane.xlu1 %1283 }
 0x1fa   : > { %v1281_v47 = vpop.xlane.xlu0 %1280  ;;  %3355 = vrsqrt.f32 %v1306_v2  ;;  %v1300_v22 = vmul.f32 0.125, %v1284_v43 }
 0x1fb   : > { %v1299_v19 = vmul.f32 0.125, %v1281_v47 }
 0x1fc   : > { %v1308_v37 = vadd.f32 1e-05, %v1300_v22 }
 0x1fd   : > { %v1307_v58 = vadd.f32 1e-05, %v1299_v19 }
 0x1fe   : > { %3357 = vrsqrt.f32 %v1308_v37 }
 0x1ff   : > { %3359 = vrsqrt.f32 %v1307_v58 }
 0x205   : > { %v3354_v36 = vpop.eup %3353 }
 0x206   : > { %v1321_v23 = vmul.f32 %v3354_v36, %v4143_v57 }
 0x207   : > { %v3356_v6 = vpop.eup %3355 }
 0x208   : > { %v1336_v27 = vmul.f32 %v3002_v26, %v1321_v23  ;;  %v1322_v59 = vmul.f32 %v3356_v6, %v4148_v33 }
 0x20a   : > { %v1337_v34 = vmul.f32 %v3002_v26, %v1322_v59  ;;  %v1351_v24 = vadd.f32 %v3003_v3, %v1336_v27 }
 0x20b   : > { %v1287_v62 = vpop.xlane.xlu0 %1286  ;;  %v3358_v42 = vpop.eup %3357 }
 0x20c   : > { %v1301_v25 = vmul.f32 0.125, %v1287_v62  ;;  %v3360_v52 = vpop.eup %3359  ;;  %v1324_v57 = vmul.f32 %v3358_v42, %v4154_v41  ;;  %v1290_v63 = vpop.xlane.xlu1 %1289  ;;  %v1352_v4 = vadd.f32 %v3003_v3, %v1337_v34 }
 0x20d   : > { %v1323_v55 = vmul.f32 %v3360_v52, %v4157_v39  ;;  %v1302_v33 = vmul.f32 0.125, %v1290_v63 }
 0x20e   : > { %v1309_v54 = vadd.f32 1e-05, %v1301_v25  ;;  %v1339_v49 = vmul.f32 %v3002_v26, %v1324_v57  ;;  %v4214_v18 = vpack.c.bf16 %v1352_v4, %v1351_v24 }
 0x20f   : > { %v1293_v61 = vpop.xlane.xlu0 %1292  ;;  %v1338_v1 = vmul.f32 %v3002_v26, %v1323_v55  ;;  %v1310_v10 = vadd.f32 1e-05, %v1302_v33 }
 0x210   : > { %3361 = vrsqrt.f32 %v1309_v54  ;;  %v1303_v9 = vmul.f32 0.125, %v1293_v61  ;;  %3157 = vmatprep.mubr.msk.bf16.mxu0 %vm1223_vm14, %v4214_v18  ;;  %3167 = vmatprep.mubr.msk.bf16.mxu1 %vm1223_vm14, %v4214_v18  ;;  %v1296_v41 = vpop.xlane.xlu1 %1295  ;;  %v1354_v11 = vadd.f32 %v3003_v3, %v1339_v49 }
 0x211   : > { %3363 = vrsqrt.f32 %v1310_v10  ;;  %v1304_v45 = vmul.f32 0.125, %v1296_v41  ;;  %v1353_v39 = vadd.f32 %v3003_v3, %v1338_v1 }
 0x212   : > { %v1311_v16 = vadd.f32 1e-05, %v1303_v9 }
 0x213   : > { %v1312_v0 = vadd.f32 1e-05, %v1304_v45  ;;  %v4220_v60 = vpack.c.bf16 %v1354_v11, %v1353_v39 }
 0x214   : > { %3365 = vrsqrt.f32 %v1311_v16 }
 0x215   : > { %3367 = vrsqrt.f32 %v1312_v0  ;;  %3158 = vmatmul.mubr.msk.bf16.vlgmr.msra.gmra.mxu0 %vm1223_vm14, %v4220_v60  ;;  %3168 = vmatmul.mubr.msk.bf16.vlgmr.msra.gmra.mxu1 %vm1223_vm14, %v4220_v60  ;;  %v3029_v0 = vld [vmem:[%s4536_s7 + $0x8] sm:$0xff] }
 0x216   : > { %3176 = vmatpush3.bf16.msra.mxu0 %v1519_v53 }
 0x21d   : > { %v3362_v48 = vpop.eup %3361 }
 0x21e   : > { %v1325_v5 = vmul.f32 %v3362_v48, %v4167_v31  ;;  %v3364_v12 = vpop.eup %3363  ;;  %v1937_v48 = vpack.c.bf16 %v3029_v0, %v3029_v0 }
 0x21f   : > { %v1326_v15 = vmul.f32 %v3364_v12, %v4172_v20 }
 0x220   : > { %v1340_v7 = vmul.f32 %v3002_v26, %v1325_v5 }
 0x221   : > { %v3366_v21 = vpop.eup %3365  ;;  %v1341_v56 = vmul.f32 %v3002_v26, %v1326_v15 }
 0x222   : > { %v1327_v17 = vmul.f32 %v3366_v21, %v4175_v8  ;;  %v3368_v35 = vpop.eup %3367  ;;  %v1355_v50 = vadd.f32 %v3003_v3, %v1340_v7  ;;  %v1939_v7 = vsel %vm1377_vm4, %v1937_v48, 0 }
 0x223   : > { %v1328_v30 = vmul.f32 %v3368_v35, %v4183_v29  ;;  %v1356_v2 = vadd.f32 %v3003_v3, %v1341_v56 }
 0x224   : > { %v1342_v38 = vmul.f32 %v3002_v26, %v1327_v17 }
 0x225   : > { %v1343_v43 = vmul.f32 %v3002_v26, %v1328_v30  ;;  %v4231_v47 = vpack.c.bf16 %v1356_v2, %v1355_v50 }
 0x226   : > { %v1357_v31 = vadd.f32 %v3003_v3, %v1342_v38 }
 0x227   : > { %3161 = vmatprep.mubr.msk.bf16.mxu0 %vm1223_vm14, %v4231_v47  ;;  %3171 = vmatprep.mubr.msk.bf16.mxu1 %vm1223_vm14, %v4231_v47  ;;  %v1358_v20 = vadd.f32 %v3003_v3, %v1343_v43 }
 0x229   : > { %v4237_v22 = vpack.c.bf16 %v1358_v20, %v1357_v31 }
 0x22b   : > { %3162 = vmatmul.mubr.msk.bf16.gmra.mxu0 %vm1223_vm14, %v4237_v22  ;;  %3172 = vmatmul.mubr.msk.bf16.gmra.mxu1 %vm1223_vm14, %v4237_v22 }
 0x22c   : > { %3177 = vmatprep.mubr.msk.bf16.mxu0 %vm1223_vm14, %v4214_v18 }
 0x233   : > { %3178 = vmatmul.mubr.msk.bf16.vlgmr.msra.gmra.mxu0 %vm1223_vm14, %v4220_v60 }
 0x234   : > { %3181 = vmatprep.mubr.msk.bf16.mxu0 %vm1223_vm14, %v4231_v47 }
 0x23b   : > { %3182 = vmatmul.mubr.msk.bf16.gmra.mxu0 %vm1223_vm14, %v4237_v22 }
 0x2d5   : > { %v3159_v8 = vpop.f32.mrf.mxu0  ;;  %v3169_v36 = vpop.f32.mrf.mxu1 }
 0x2d7   : > { %v1415_v29 = vpop.f32.mrf.mxu0  ;;  %v1485_v23 = vpop.f32.mrf.mxu1 }
 0x2d9   : > { %v3160_v19 = vpop.f32.mrf.mxu0  ;;  %v3170_v26 = vpop.f32.mrf.mxu1 }
 0x2da   : > { %v1591_v33 = vpack.c.bf16 %v3170_v26, %v3169_v36  ;;  %v1587_v21 = vpack.c.bf16 %v3160_v19, %v3159_v8 }
 0x2db   : > { %v1418_v37 = vpop.f32.mrf.mxu0  ;;  %v1488_v6 = vpop.f32.mrf.mxu1 }
 0x2dc   : > { %v1586_v58 = vpack.c.bf16 %v1418_v37, %v1415_v29  ;;  %v1611_v11 = vsel %vm1594_vm5, %v1591_v33, 0  ;;  %v1590_v45 = vpack.c.bf16 %v1488_v6, %v1485_v23 }
 0x2de   : > { %3193 = vmatprep.mubr.msk.bf16.mxu1 %vm1594_vm5, %v1586_v58  ;;  %v1608_v5 = vsel %vm1594_vm5, %v1590_v45, 0 }
 0x2eb   : > { %v3163_v27 = vpop.f32.mrf.mxu0  ;;  %v3173_v59 = vpop.f32.mrf.mxu1 }
 0x2ed   : > { %v1431_v62 = vpop.f32.mrf.mxu0  ;;  %v1501_v25 = vpop.f32.mrf.mxu1 }
 0x2ef   : > { %v3164_v3 = vpop.f32.mrf.mxu0  ;;  %v3174_v34 = vpop.f32.mrf.mxu1 }
 0x2f0   : > { %v1593_v42 = vpack.c.bf16 %v3174_v34, %v3173_v59  ;;  %v1589_v17 = vpack.c.bf16 %v3164_v3, %v3163_v27 }
 0x2f1   : > { %v1434_v54 = vpop.f32.mrf.mxu0  ;;  %v1504_v52 = vpop.f32.mrf.mxu1 }
 0x2f2   : > { %v1617_v57 = vsel %vm1594_vm5, %v1593_v42, 0  ;;  %v1592_v63 = vpack.c.bf16 %v1504_v52, %v1501_v25  ;;  %3322 = vmatprep.subr.msk.bf16.mxu1 %vm1594_vm5, %v1593_v42  ;;  %v1588_v15 = vpack.c.bf16 %v1434_v54, %v1431_v62 }
 0x2f3   : > { %v3179_v61 = vpop.f32.mrf.mxu0  ;;  %3186 = vmatpush3.bf16.xpose.msra.mxu1 %v1617_v57 }
 0x2f4   : > { %3323 = vmatprep.subr.msk.bf16.mxu1 %vm1594_vm5, %v1592_v63  ;;  %v1614_v9 = vsel %vm1594_vm5, %v1592_v63, 0 }
 0x2f5   : > { %v1555_v24 = vpop.f32.mrf.mxu0 }
 0x2f7   : > { %v3180_v4 = vpop.f32.mrf.mxu0 }
 0x2f8   : > { %v1778_v53 = vpack.c.bf16 %v3180_v4, %v3179_v61 }
 0x2f9   : > { %v1558_v55 = vpop.f32.mrf.mxu0 }
 0x2fa   : > { %v1777_v12 = vpack.c.bf16 %v1558_v55, %v1555_v24 }
 0x2fb   : > { %v3183_v49 = vpop.f32.mrf.mxu0  ;;  %3188 = vmatpush3.bf16.xpose.msra.mxu1 %v1614_v9 }
 0x2fc   : > { %3324 = vmatprep.subr.msk.bf16.mxu1 %vm1594_vm5, %v1591_v33 }
 0x2fd   : > { %v1571_v1 = vpop.f32.mrf.mxu0 }
 0x2ff   : > { %v3184_v10 = vpop.f32.mrf.mxu0 }
 0x300   : > { %v1780_v16 = vpack.c.bf16 %v3184_v10, %v3183_v49 }
 0x301   : > { %v1574_v41 = vpop.f32.mrf.mxu0 }
 0x302   : > { %v1779_v39 = vpack.c.bf16 %v1574_v41, %v1571_v1  ;;  %3201 = vmatprep.subr.bf16.mxu0 %v1780_v16 }
 0x303   : > { %3190 = vmatpush3.bf16.xpose.msra.mxu1 %v1611_v11  ;;  %3202 = vmatpush3.bf16.msra.mxu0 %v1780_v16 }
 0x304   : > { %3325 = vmatprep.subr.msk.bf16.mxu1 %vm1594_vm5, %v1590_v45  ;;  %3203 = vmatprep.subr.bf16.mxu0 %v1779_v39 }
 0x307   : > { %3204 = vmatpush3.bf16.msra.mxu0 %v1779_v39 }
 0x308   : > { %3205 = vmatprep.subr.bf16.mxu0 %v1778_v53 }
 0x30b   : > { %3192 = vmatpush3.bf16.xpose.msra.mxu1 %v1608_v5  ;;  %3206 = vmatpush3.bf16.msra.mxu0 %v1778_v53 }
 0x30c   : > { %3207 = vmatprep.subr.bf16.mxu0 %v1777_v12  ;;  %3327 = vmatprep.subr.msk.bf16.mxu1 %vm1377_vm4, %v1937_v48 }
 0x30f   : > { %3208 = vmatpush3.bf16.msra.mxu0 %v1777_v12 }
 0x312   : > { %3194 = vmatmul.mubr.msk.bf16.vlgmr.msra.gmra.mxu1 %vm1594_vm5, %v1587_v21 }
 0x313   : > { %3197 = vmatprep.mubr.msk.bf16.mxu1 %vm1594_vm5, %v1588_v15  ;;  %3228 = vmatpush3.bf16.msra.mxu1 %v1939_v7 }
 0x31a   : > { %3198 = vmatmul.mubr.msk.bf16.gmra.mxu1 %vm1594_vm5, %v1589_v17 }
 0x31b   : > { %3229 = vmatprep.mubr.msk.bf16.mxu1 %vm1223_vm14, %v4214_v18 }
 0x322   : > { %3230 = vmatmul.mubr.msk.bf16.vlgmr.msra.gmra.mxu1 %vm1223_vm14, %v4220_v60 }
 0x323   : > { %3233 = vmatprep.mubr.msk.bf16.mxu1 %vm1223_vm14, %v4231_v47 }
 0x32a   : > { %3234 = vmatmul.mubr.msk.bf16.gmra.mxu1 %vm1223_vm14, %v4237_v22 }
 0x3d2   : > { %v3195_v56 = vpop.f32.mrf.mxu1 }
 0x3d3   : > { %v1691_v2 = vsel %vm1684_vm6, %v3195_v56, -inf }
 0x3d4   : > { %v1653_v35 = vpop.f32.mrf.mxu1 }
 0x3d5   : > { %v1685_v38 = vsel %vm1684_vm6, %v1653_v35, -inf }
 0x3d6   : > { %1686 = vmax.xlane.f32.xlu0 %v1685_v38  ;;  %v3196_v30 = vpop.f32.mrf.mxu1 }
 0x3d7   : > { %v1694_v8 = vsel %vm1684_vm6, %v3196_v30, -inf }
 0x3d8   : > { %v1656_v50 = vpop.f32.mrf.mxu1 }
 0x3d9   : > { %v1688_v43 = vsel %vm1684_vm6, %v1656_v50, -inf }
 0x3da   : > { %1692 = vmax.xlane.f32.xlu0 %v1691_v2  ;;  %1689 = vmax.xlane.f32.xlu1 %v1688_v43  ;;  %v3199_v31 = vpop.f32.mrf.mxu1 }
 0x3db   : > { %v1703_v58 = vsel %vm1684_vm6, %v3199_v31, -inf }
 0x3dc   : > { %v1669_v20 = vpop.f32.mrf.mxu1 }
 0x3dd   : > { %v1697_v29 = vsel %vm1684_vm6, %v1669_v20, -inf }
 0x3de   : > { %1695 = vmax.xlane.f32.xlu1 %v1694_v8  ;;  %1698 = vmax.xlane.f32.xlu0 %v1697_v29  ;;  %v4281_v19 = vpop.f32.mrf.mxu1 }
 0x3df   : > { %v1706_v6 = vsel %vm1684_vm6, %v4281_v19, -inf }
 0x3e0   : > { %v1672_v37 = vpop.f32.mrf.mxu1 }
 0x3e1   : > { %v1700_v36 = vsel %vm1684_vm6, %v1672_v37, -inf }
 0x3e2   : > { %1704 = vmax.xlane.f32.xlu0 %v1703_v58  ;;  %v3231_v23 = vpop.f32.mrf.mxu1  ;;  %1701 = vmax.xlane.f32.xlu1 %v1700_v36 }
 0x3e4   : > { %v1975_v26 = vpop.f32.mrf.mxu1 }
 0x3e6   : > { %v3232_v27 = vpop.f32.mrf.mxu1  ;;  %1707 = vmax.xlane.f32.xlu1 %v1706_v6 }
 0x3e7   : > { %v2082_v57 = vpack.c.bf16 %v3232_v27, %v3231_v23 }
 0x3e8   : > { %v1978_v59 = vpop.f32.mrf.mxu1 }
 0x3e9   : > { %v2101_v61 = vsel %vm1594_vm5, %v2082_v57, 0  ;;  %v2081_v24 = vpack.c.bf16 %v1978_v59, %v1975_v26 }
 0x3ea   : > { %v3235_v62 = vpop.f32.mrf.mxu1 }
 0x3eb   : > { %v2098_v4 = vsel %vm1594_vm5, %v2081_v24, 0 }
 0x3ec   : > { %v1991_v25 = vpop.f32.mrf.mxu1 }
 0x3ee   : > { %v3236_v3 = vpop.f32.mrf.mxu1 }
 0x3ef   : > { %v2084_v34 = vpack.c.bf16 %v3236_v3, %v3235_v62  ;;  %v3024_v62 = vld [vmem:[%s4535_s6 + $0x8] sm:$0xff] }
 0x3f0   : > { %v1994_v42 = vpop.f32.mrf.mxu1 }
 0x3f1   : > { %v2107_v54 = vsel %vm1594_vm5, %v2084_v34, 0  ;;  %v2083_v52 = vpack.c.bf16 %v1994_v42, %v1991_v25  ;;  %3329 = vmatprep.subr.msk.bf16.mxu1 %vm1594_vm5, %v2084_v34  ;;  %v1866_v25 = vpack.c.bf16 %v3024_v62, %v3024_v62 }
 0x3f2   : > { %3248 = vmatpush3.bf16.xpose.msra.mxu1 %v2107_v54 }
 0x3f3   : > { %3330 = vmatprep.subr.msk.bf16.mxu1 %vm1594_vm5, %v2083_v52  ;;  %v2104_v63 = vsel %vm1594_vm5, %v2083_v52, 0  ;;  %3326 = vmatprep.subr.msk.bf16.mxu0 %vm1377_vm4, %v1866_v25 }
 0x3fa   : > { %3250 = vmatpush3.bf16.xpose.msra.mxu1 %v2104_v63 }
 0x3fb   : > { %3331 = vmatprep.subr.msk.bf16.mxu1 %vm1594_vm5, %v2082_v57 }
 0x402   : > { %3252 = vmatpush3.bf16.xpose.msra.mxu1 %v2101_v61 }
 0x403   : > { %3332 = vmatprep.subr.msk.bf16.mxu1 %vm1594_vm5, %v2081_v24 }
 0x40a   : > { %3254 = vmatpush3.bf16.xpose.msra.mxu1 %v2098_v4 }
 0x45f   : > { %v1687_v55 = vpop.xlane.xlu0 %1686 }
 0x460   : > { %v1709_v33 = vsub.f32 %v1653_v35, %v1687_v55 }
 0x462   : > { %v1717_v9 = vmul.f32 1.442695, %v1709_v33 }
 0x463   : > { %v1693_v49 = vpop.xlane.xlu0 %1692  ;;  %v1690_v1 = vpop.xlane.xlu1 %1689 }
 0x464   : > { %3369 = vpow2.f32 %v1717_v9  ;;  %v1711_v10 = vsub.f32 %v3195_v56, %v1693_v49  ;;  %v1710_v16 = vsub.f32 %v1656_v50, %v1690_v1 }
 0x466   : > { %v1721_v41 = vmul.f32 1.442695, %v1711_v10  ;;  %v1719_v11 = vmul.f32 1.442695, %v1710_v16  ;;  %v3034_v10 = vld [vmem:[%s4537_s8 + $0x8] sm:$0xff] }
 0x467   : > { %v1696_v45 = vpop.xlane.xlu1 %1695  ;;  %v1699_v39 = vpop.xlane.xlu0 %1698 }
 0x468   : > { %3371 = vpow2.f32 %v1721_v41  ;;  %v1712_v0 = vsub.f32 %v3196_v30, %v1696_v45  ;;  %v1713_v53 = vsub.f32 %v1669_v20, %v1699_v39  ;;  %v1868_v39 = vsel %vm1377_vm4, %v1866_v25, 0 }
 0x469   : > { %3373 = vpow2.f32 %v1719_v11 }
 0x46a   : > { %v1723_v48 = vmul.f32 1.442695, %v1712_v0  ;;  %v1725_v5 = vmul.f32 1.442695, %v1713_v53  ;;  %v2008_v0 = vpack.c.bf16 %v3034_v10, %v3034_v10 }
 0x46b   : > { %v1705_v12 = vpop.xlane.xlu0 %1704  ;;  %v1702_v21 = vpop.xlane.xlu1 %1701 }
 0x46c   : > { %3375 = vpow2.f32 %v1723_v48  ;;  %v1715_v7 = vsub.f32 %v3199_v31, %v1705_v12  ;;  %v1714_v15 = vsub.f32 %v1672_v37, %v1702_v21 }
 0x46d   : > { %3377 = vpow2.f32 %v1725_v5 }
 0x46e   : > { %v1729_v17 = vmul.f32 1.442695, %v1715_v7  ;;  %v1727_v35 = vmul.f32 1.442695, %v1714_v15 }
 0x46f   : > { %v1708_v56 = vpop.xlane.xlu1 %1707 }
 0x470   : > { %3379 = vpow2.f32 %v1729_v17  ;;  %v1716_v38 = vsub.f32 %v4281_v19, %v1708_v56  ;;  %v2010_v56 = vsel %vm1377_vm4, %v2008_v0, 0 }
 0x471   : > { %v3370_v50 = vpop.eup %3369  ;;  %3381 = vpow2.f32 %v1727_v35 }
 0x472   : > { %v1731_v2 = vmul.f32 1.442695, %v1716_v38  ;;  %v1733_v30 = vsel %vm1684_vm6, %v3370_v50, 0.0  ;;  %v1858_v38 = vld [vmem:[%s4538_s9] sm:$0xf] }
 0x473   : > { %1734 = vadd.xlane.f32.xlu0 %v1733_v30 }
 0x474   : > { %3383 = vpow2.f32 %v1731_v2 }
 0x475   : > { %v3372_v43 = vpop.eup %3371 }
 0x476   : > { %v3374_v20 = vpop.eup %3373  ;;  %v1739_v8 = vsel %vm1684_vm6, %v3372_v43, 0.0 }
 0x477   : > { %1740 = vadd.xlane.f32.xlu0 %v1739_v8  ;;  %v1736_v31 = vsel %vm1684_vm6, %v3374_v20, 0.0 }
 0x478   : > { %1737 = vadd.xlane.f32.xlu1 %v1736_v31 }
 0x479   : > { %v3376_v29 = vpop.eup %3375 }
 0x47a   : > { %v3378_v37 = vpop.eup %3377  ;;  %v1742_v58 = vsel %vm1684_vm6, %v3376_v29, 0.0 }
 0x47b   : > { %v1745_v19 = vsel %vm1684_vm6, %v3378_v37, 0.0 }
 0x47c   : > { %1746 = vadd.xlane.f32.xlu0 %v1745_v19  ;;  %1743 = vadd.xlane.f32.xlu1 %v1742_v58 }
 0x47d   : > { %v3380_v36 = vpop.eup %3379 }
 0x47e   : > { %v3382_v23 = vpop.eup %3381  ;;  %v1751_v26 = vsel %vm1684_vm6, %v3380_v36, 0.0 }
 0x47f   : > { %v1748_v6 = vsel %vm1684_vm6, %v3382_v23, 0.0 }
 0x480   : > { %1752 = vadd.xlane.f32.xlu0 %v1751_v26  ;;  %1749 = vadd.xlane.f32.xlu1 %v1748_v6 }
 0x481   : > { %v3384_v27 = vpop.eup %3383 }
 0x482   : > { %v1754_v59 = vsel %vm1684_vm6, %v3384_v27, 0.0 }
 0x484   : > { %1755 = vadd.xlane.f32.xlu1 %v1754_v59 }
 0x4fc   : > { %v1735_v3 = vpop.xlane.xlu0 %1734 }
 0x4fd   : > { %3385 = vrcp.f32 %v1735_v3 }
 0x500   : > { %v1741_v34 = vpop.xlane.xlu0 %1740 }
 0x501   : > { %v1738_v42 = vpop.xlane.xlu1 %1737 }
 0x502   : > { %3387 = vrcp.f32 %v1738_v42 }
 0x503   : > { %3389 = vrcp.f32 %v1741_v34 }
 0x505   : > { %v1747_v54 = vpop.xlane.xlu0 %1746  ;;  %v1744_v52 = vpop.xlane.xlu1 %1743 }
 0x506   : > { %3391 = vrcp.f32 %v1744_v52 }
 0x507   : > { %3393 = vrcp.f32 %v1747_v54 }
 0x509   : > { %v1753_v57 = vpop.xlane.xlu0 %1752  ;;  %v1750_v63 = vpop.xlane.xlu1 %1749 }
 0x50a   : > { %3395 = vrcp.f32 %v1750_v63  ;;  %v3386_v61 = vpop.eup %3385 }
 0x50b   : > { %3397 = vrcp.f32 %v1753_v57  ;;  %v1765_v55 = vmul.f32 %v3386_v61, %v3370_v50  ;;  %v1863_v50 = vpack.c.bf16 %v1858_v38, %v1858_v38 }
 0x50d   : > { %v1756_v24 = vpop.xlane.xlu1 %1755  ;;  %3334 = vmatprep.subr.msk.bf16.mxu1 %vm2366_vm7, %v1863_v50 }
 0x50e   : > { %3399 = vrcp.f32 %v1756_v24 }
 0x50f   : > { %v3388_v4 = vpop.eup %3387 }
 0x510   : > { %v1766_v33 = vmul.f32 %v3388_v4, %v3374_v20  ;;  %v3390_v9 = vpop.eup %3389 }
 0x511   : > { %v1767_v16 = vmul.f32 %v3390_v9, %v3372_v43 }
 0x512   : > { %v1773_v49 = vpack.c.bf16 %v1766_v33, %v1765_v55 }
 0x513   : > { %v3392_v1 = vpop.eup %3391 }
 0x514   : > { %3209 = vmatprep.mubr.msk.bf16.mxu0 %vm1684_vm6, %v1773_v49  ;;  %v1768_v41 = vmul.f32 %v3392_v1, %v3376_v29  ;;  %v3394_v11 = vpop.eup %3393 }
 0x515   : > { %v1769_v5 = vmul.f32 %v3394_v11, %v3378_v37 }
 0x516   : > { %v1774_v45 = vpack.c.bf16 %v1768_v41, %v1767_v16 }
 0x517   : > { %v3396_v53 = vpop.eup %3395 }
 0x518   : > { %v3398_v48 = vpop.eup %3397  ;;  %3210 = vmatmul.mubr.msk.bf16.vlgmr.msra.gmra.mxu0 %vm1684_vm6, %v1774_v45  ;;  %v1770_v12 = vmul.f32 %v3396_v53, %v3382_v23  ;;  %v2448_v23 = vsel %vm2366_vm7, %v1863_v50, 0 }
 0x519   : > { %3218 = vmatpush3.bf16.msra.mxu0 %v1868_v39  ;;  %v1771_v15 = vmul.f32 %v3398_v48, %v3380_v36 }
 0x51a   : > { %v1775_v7 = vpack.c.bf16 %v1770_v12, %v1769_v5  ;;  %3328 = vmatprep.subr.msk.bf16.mxu0 %vm1377_vm4, %v2008_v0 }
 0x51b   : > { %v3400_v21 = vpop.eup %3399 }
 0x51c   : > { %v1772_v17 = vmul.f32 %v3400_v21, %v3384_v27  ;;  %3213 = vmatprep.mubr.msk.bf16.mxu0 %vm1684_vm6, %v1775_v7 }
 0x51e   : > { %v1776_v35 = vpack.c.bf16 %v1772_v17, %v1771_v15 }
 0x520   : > { %3214 = vmatmul.mubr.msk.bf16.gmra.mxu0 %vm1684_vm6, %v1776_v35 }
 0x521   : > { %3219 = vmatprep.mubr.msk.bf16.mxu0 %vm1223_vm14, %v4214_v18 }
 0x528   : > { %3220 = vmatmul.mubr.msk.bf16.vlgmr.msra.gmra.mxu0 %vm1223_vm14, %v4220_v60 }
 0x529   : > { %3223 = vmatprep.mubr.msk.bf16.mxu0 %vm1223_vm14, %v4231_v47  ;;  %3238 = vmatpush3.bf16.msra.mxu0 %v2010_v56 }
 0x530   : > { %3224 = vmatmul.mubr.msk.bf16.gmra.mxu0 %vm1223_vm14, %v4237_v22 }
 0x531   : > { %3239 = vmatprep.mubr.msk.bf16.mxu0 %vm1223_vm14, %v4214_v18 }
 0x538   : > { %3240 = vmatmul.mubr.msk.bf16.vlgmr.msra.gmra.mxu0 %vm1223_vm14, %v4220_v60 }
 0x539   : > { %3243 = vmatprep.mubr.msk.bf16.mxu0 %vm1223_vm14, %v4231_v47 }
 0x540   : > { %3244 = vmatmul.mubr.msk.bf16.gmra.mxu0 %vm1223_vm14, %v4237_v22 }
 0x5d8   : > { %v3211_v2 = vpop.f32.mrf.mxu0 }
 0x5da   : > { %v1827_v30 = vpop.f32.mrf.mxu0 }
 0x5dc   : > { %v3212_v18 = vpop.f32.mrf.mxu0 }
 0x5dd   : > { %v1860_v52 = vpack.c.bf16 %v3212_v18, %v3211_v2 }
 0x5de   : > { %v1830_v43 = vpop.f32.mrf.mxu0 }
 0x5df   : > { %v1859_v3 = vpack.c.bf16 %v1830_v43, %v1827_v30 }
 0x5e0   : > { %v3215_v20 = vpop.f32.mrf.mxu0 }
 0x5e2   : > { %v1843_v60 = vpop.f32.mrf.mxu0 }
 0x5e4   : > { %v3216_v8 = vpop.f32.mrf.mxu0 }
 0x5e5   : > { %v1862_v9 = vpack.c.bf16 %v3216_v8, %v3215_v20 }
 0x5e6   : > { %v1846_v31 = vpop.f32.mrf.mxu0 }
 0x5e7   : > { %v1861_v63 = vpack.c.bf16 %v1846_v31, %v1843_v60 }
 0x5e8   : > { %v3221_v47 = vpop.f32.mrf.mxu0 }
 0x5ea   : > { %v1904_v29 = vpop.f32.mrf.mxu0 }
 0x5ec   : > { %v3222_v37 = vpop.f32.mrf.mxu0 }
 0x5ed   : > { %v2078_v19 = vpack.c.bf16 %v3222_v37, %v3221_v47 }
 0x5ee   : > { %v1907_v22 = vpop.f32.mrf.mxu0 }
 0x5ef   : > { %v2077_v58 = vpack.c.bf16 %v1907_v22, %v1904_v29 }
 0x5f0   : > { %v3225_v36 = vpop.f32.mrf.mxu0 }
 0x5f1   : > { %3255 = vmatprep.mubr.msk.bf16.mxu1 %vm1594_vm5, %v2077_v58 }
 0x5f2   : > { %v1920_v26 = vpop.f32.mrf.mxu0  ;;  %3256 = vmatmul.mubr.msk.bf16.vlgmr.msra.gmra.mxu1 %vm1594_vm5, %v2078_v19 }
 0x5f3   : > { %3290 = vmatpush3.bf16.msra.mxu1 %v2448_v23 }
 0x5f4   : > { %v3226_v6 = vpop.f32.mrf.mxu0 }
 0x5f5   : > { %v2080_v62 = vpack.c.bf16 %v3226_v6, %v3225_v36 }
 0x5f6   : > { %v1923_v27 = vpop.f32.mrf.mxu0 }
 0x5f7   : > { %v2079_v59 = vpack.c.bf16 %v1923_v27, %v1920_v26 }
 0x5f8   : > { %v3241_v25 = vpop.f32.mrf.mxu0 }
 0x5f9   : > { %3259 = vmatprep.mubr.msk.bf16.mxu1 %vm1594_vm5, %v2079_v59 }
 0x5fa   : > { %v2046_v34 = vpop.f32.mrf.mxu0  ;;  %3260 = vmatmul.mubr.msk.bf16.gmra.mxu1 %vm1594_vm5, %v2080_v62 }
 0x5fb   : > { %3291 = vmatprep.mubr.msk.bf16.mxu1 %vm1594_vm5, %v1859_v3 }
 0x5fc   : > { %v3242_v42 = vpop.f32.mrf.mxu0 }
 0x5fd   : > { %v2267_v49 = vpack.c.bf16 %v3242_v42, %v3241_v25 }
 0x5fe   : > { %v2049_v54 = vpop.f32.mrf.mxu0 }
 0x5ff   : > { %v2266_v1 = vpack.c.bf16 %v2049_v54, %v2046_v34 }
 0x600   : > { %v3245_v57 = vpop.f32.mrf.mxu0 }
 0x602   : > { %v2062_v61 = vpop.f32.mrf.mxu0  ;;  %3292 = vmatmul.mubr.msk.bf16.vlgmr.msra.gmra.mxu1 %vm1594_vm5, %v1860_v52 }
 0x603   : > { %3295 = vmatprep.mubr.msk.bf16.mxu1 %vm1594_vm5, %v1861_v63 }
 0x604   : > { %v3246_v24 = vpop.f32.mrf.mxu0 }
 0x605   : > { %v2269_v4 = vpack.c.bf16 %v3246_v24, %v3245_v57 }
 0x606   : > { %v2065_v55 = vpop.f32.mrf.mxu0 }
 0x607   : > { %v2268_v33 = vpack.c.bf16 %v2065_v55, %v2062_v61  ;;  %3263 = vmatprep.subr.bf16.mxu0 %v2269_v4 }
 0x608   : > { %3264 = vmatpush3.bf16.msra.mxu0 %v2269_v4 }
 0x609   : > { %3265 = vmatprep.subr.bf16.mxu0 %v2268_v33 }
 0x60a   : > { %3296 = vmatmul.mubr.msk.bf16.gmra.mxu1 %vm1594_vm5, %v1862_v9 }
 0x60c   : > { %3266 = vmatpush3.bf16.msra.mxu0 %v2268_v33 }
 0x60d   : > { %3267 = vmatprep.subr.bf16.mxu0 %v2267_v49 }
 0x610   : > { %3268 = vmatpush3.bf16.msra.mxu0 %v2267_v49 }
 0x611   : > { %3269 = vmatprep.subr.bf16.mxu0 %v2266_v1 }
 0x614   : > { %3270 = vmatpush3.bf16.msra.mxu0 %v2266_v1 }
 0x6b2   : > { %v3257_v10 = vpop.f32.mrf.mxu1 }
 0x6b3   : > { %v2180_v39 = vsel %vm1684_vm6, %v3257_v10, -inf }
 0x6b4   : > { %v2143_v16 = vpop.f32.mrf.mxu1 }
 0x6b5   : > { %v2174_v41 = vsel %vm1684_vm6, %v2143_v16, -inf }
 0x6b6   : > { %2175 = vmax.xlane.f32.xlu0 %v2174_v41  ;;  %v3258_v11 = vpop.f32.mrf.mxu1 }
 0x6b7   : > { %v2183_v5 = vsel %vm1684_vm6, %v3258_v11, -inf }
 0x6b8   : > { %v2146_v45 = vpop.f32.mrf.mxu1 }
 0x6b9   : > { %v2177_v0 = vsel %vm1684_vm6, %v2146_v45, -inf }
 0x6ba   : > { %2181 = vmax.xlane.f32.xlu0 %v2180_v39  ;;  %2178 = vmax.xlane.f32.xlu1 %v2177_v0  ;;  %v3261_v53 = vpop.f32.mrf.mxu1 }
 0x6bb   : > { %v2192_v15 = vsel %vm1684_vm6, %v3261_v53, -inf }
 0x6bc   : > { %v2159_v48 = vpop.f32.mrf.mxu1 }
 0x6bd   : > { %v2186_v12 = vsel %vm1684_vm6, %v2159_v48, -inf }
 0x6be   : > { %2184 = vmax.xlane.f32.xlu1 %v2183_v5  ;;  %2187 = vmax.xlane.f32.xlu0 %v2186_v12  ;;  %v3262_v21 = vpop.f32.mrf.mxu1 }
 0x6bf   : > { %v2195_v35 = vsel %vm1684_vm6, %v3262_v21, -inf }
 0x6c0   : > { %v2162_v7 = vpop.f32.mrf.mxu1 }
 0x6c1   : > { %v2189_v17 = vsel %vm1684_vm6, %v2162_v7, -inf }
 0x6c2   : > { %2193 = vmax.xlane.f32.xlu0 %v2192_v15  ;;  %2190 = vmax.xlane.f32.xlu1 %v2189_v17 }
 0x6c6   : > { %2196 = vmax.xlane.f32.xlu1 %v2195_v35 }
 0x73f   : > { %v2176_v56 = vpop.xlane.xlu0 %2175 }
 0x740   : > { %v2198_v38 = vsub.f32 %v2143_v16, %v2176_v56 }
 0x742   : > { %v2206_v50 = vmul.f32 1.442695, %v2198_v38 }
 0x743   : > { %v2182_v2 = vpop.xlane.xlu0 %2181  ;;  %v2179_v30 = vpop.xlane.xlu1 %2178 }
 0x744   : > { %3401 = vpow2.f32 %v2206_v50  ;;  %v2200_v18 = vsub.f32 %v3257_v10, %v2182_v2  ;;  %v2199_v43 = vsub.f32 %v2146_v45, %v2179_v30  ;;  %v3047_v10 = vld [vmem:[%s4538_s9 + $0x4] sm:$0xf] }
 0x745   : > { %v2353_v16 = vpack.c.bf16 %v3047_v10, %v3047_v10 }
 0x746   : > { %v2210_v20 = vmul.f32 1.442695, %v2200_v18  ;;  %v2208_v60 = vmul.f32 1.442695, %v2199_v43 }
 0x747   : > { %v2185_v8 = vpop.xlane.xlu1 %2184  ;;  %v2188_v31 = vpop.xlane.xlu0 %2187  ;;  %3333 = vmatprep.subr.msk.bf16.mxu0 %vm2366_vm7, %v2353_v16  ;;  %v2368_v18 = vsel %vm2366_vm7, %v2353_v16, 0 }
 0x748   : > { %3403 = vpow2.f32 %v2210_v20  ;;  %v2201_v47 = vsub.f32 %v3258_v11, %v2185_v8  ;;  %v2202_v29 = vsub.f32 %v2159_v48, %v2188_v31 }
 0x749   : > { %3405 = vpow2.f32 %v2208_v60 }
 0x74a   : > { %v2212_v37 = vmul.f32 1.442695, %v2201_v47  ;;  %v2214_v22 = vmul.f32 1.442695, %v2202_v29 }
 0x74b   : > { %v2194_v58 = vpop.xlane.xlu0 %2193  ;;  %v2191_v19 = vpop.xlane.xlu1 %2190 }
 0x74c   : > { %3407 = vpow2.f32 %v2212_v37  ;;  %v2204_v36 = vsub.f32 %v3261_v53, %v2194_v58  ;;  %v2203_v23 = vsub.f32 %v2162_v7, %v2191_v19 }
 0x74d   : > { %3409 = vpow2.f32 %v2214_v22 }
 0x74e   : > { %v2218_v26 = vmul.f32 1.442695, %v2204_v36  ;;  %v2216_v6 = vmul.f32 1.442695, %v2203_v23 }
 0x74f   : > { %v2197_v27 = vpop.xlane.xlu1 %2196 }
 0x750   : > { %3411 = vpow2.f32 %v2218_v26  ;;  %v2205_v59 = vsub.f32 %v3262_v21, %v2197_v27 }
 0x751   : > { %v3402_v62 = vpop.eup %3401  ;;  %3413 = vpow2.f32 %v2216_v6 }
 0x752   : > { %v2220_v25 = vmul.f32 1.442695, %v2205_v59  ;;  %v2222_v3 = vsel %vm1684_vm6, %v3402_v62, 0.0 }
 0x753   : > { %2223 = vadd.xlane.f32.xlu0 %v2222_v3 }
 0x754   : > { %3415 = vpow2.f32 %v2220_v25 }
 0x755   : > { %v3404_v34 = vpop.eup %3403 }
 0x756   : > { %v3406_v42 = vpop.eup %3405  ;;  %v2228_v54 = vsel %vm1684_vm6, %v3404_v34, 0.0 }
 0x757   : > { %2229 = vadd.xlane.f32.xlu0 %v2228_v54  ;;  %v2225_v52 = vsel %vm1684_vm6, %v3406_v42, 0.0 }
 0x758   : > { %2226 = vadd.xlane.f32.xlu1 %v2225_v52 }
 0x759   : > { %v3408_v57 = vpop.eup %3407 }
 0x75a   : > { %v3410_v63 = vpop.eup %3409  ;;  %v2231_v61 = vsel %vm1684_vm6, %v3408_v57, 0.0 }
 0x75b   : > { %v2234_v24 = vsel %vm1684_vm6, %v3410_v63, 0.0 }
 0x75c   : > { %2235 = vadd.xlane.f32.xlu0 %v2234_v24  ;;  %2232 = vadd.xlane.f32.xlu1 %v2231_v61 }
 0x75d   : > { %v3412_v4 = vpop.eup %3411 }
 0x75e   : > { %v3414_v55 = vpop.eup %3413  ;;  %v2240_v33 = vsel %vm1684_vm6, %v3412_v4, 0.0 }
 0x75f   : > { %v2237_v9 = vsel %vm1684_vm6, %v3414_v55, 0.0 }
 0x760   : > { %2241 = vadd.xlane.f32.xlu0 %v2240_v33  ;;  %2238 = vadd.xlane.f32.xlu1 %v2237_v9 }
 0x761   : > { %v3416_v49 = vpop.eup %3415 }
 0x762   : > { %v2243_v1 = vsel %vm1684_vm6, %v3416_v49, 0.0 }
 0x764   : > { %2244 = vadd.xlane.f32.xlu1 %v2243_v1 }
 0x7dc   : > { %v2224_v41 = vpop.xlane.xlu0 %2223 }
 0x7dd   : > { %3417 = vrcp.f32 %v2224_v41 }
 0x7e0   : > { %v2230_v11 = vpop.xlane.xlu0 %2229 }
 0x7e1   : > { %v2227_v45 = vpop.xlane.xlu1 %2226 }
 0x7e2   : > { %3419 = vrcp.f32 %v2227_v45 }
 0x7e3   : > { %3421 = vrcp.f32 %v2230_v11 }
 0x7e5   : > { %v2236_v39 = vpop.xlane.xlu0 %2235  ;;  %v2233_v0 = vpop.xlane.xlu1 %2232 }
 0x7e6   : > { %3423 = vrcp.f32 %v2233_v0 }
 0x7e7   : > { %3425 = vrcp.f32 %v2236_v39 }
 0x7e9   : > { %v2242_v53 = vpop.xlane.xlu0 %2241  ;;  %v2239_v48 = vpop.xlane.xlu1 %2238 }
 0x7ea   : > { %3427 = vrcp.f32 %v2239_v48  ;;  %v3418_v5 = vpop.eup %3417 }
 0x7eb   : > { %3429 = vrcp.f32 %v2242_v53  ;;  %v2254_v7 = vmul.f32 %v3418_v5, %v3402_v62 }
 0x7ed   : > { %v2245_v12 = vpop.xlane.xlu1 %2244 }
 0x7ee   : > { %3431 = vrcp.f32 %v2245_v12 }
 0x7ef   : > { %v3420_v21 = vpop.eup %3419 }
 0x7f0   : > { %v2255_v15 = vmul.f32 %v3420_v21, %v3406_v42  ;;  %v3422_v17 = vpop.eup %3421  ;;  %v3293_v42 = vpop.f32.mrf.mxu1 }
 0x7f1   : > { %v2256_v38 = vmul.f32 %v3422_v17, %v3404_v34 }
 0x7f2   : > { %v2262_v35 = vpack.c.bf16 %v2255_v15, %v2254_v7  ;;  %v2484_v54 = vpop.f32.mrf.mxu1 }
 0x7f3   : > { %v3424_v56 = vpop.eup %3423 }
 0x7f4   : > { %3271 = vmatprep.mubr.msk.bf16.mxu0 %vm1684_vm6, %v2262_v35  ;;  %v2257_v50 = vmul.f32 %v3424_v56, %v3408_v57  ;;  %v3426_v2 = vpop.eup %3425  ;;  %v3294_v52 = vpop.f32.mrf.mxu1 }
 0x7f5   : > { %v2258_v60 = vmul.f32 %v3426_v2, %v3410_v63 }
 0x7f6   : > { %v2263_v30 = vpack.c.bf16 %v2257_v50, %v2256_v38  ;;  %v2487_v57 = vpop.f32.mrf.mxu1 }
 0x7f7   : > { %v3428_v43 = vpop.eup %3427 }
 0x7f8   : > { %v3430_v20 = vpop.eup %3429  ;;  %3272 = vmatmul.mubr.msk.bf16.vlgmr.msra.gmra.mxu0 %vm1684_vm6, %v2263_v30  ;;  %v2259_v8 = vmul.f32 %v3428_v43, %v3414_v55  ;;  %v3297_v24 = vpop.f32.mrf.mxu1 }
 0x7f9   : > { %3280 = vmatpush3.bf16.msra.mxu0 %v2368_v18  ;;  %v2260_v29 = vmul.f32 %v3430_v20, %v3412_v4 }
 0x7fa   : > { %v2264_v47 = vpack.c.bf16 %v2259_v8, %v2258_v60  ;;  %v2500_v16 = vpop.f32.mrf.mxu1 }
 0x7fb   : > { %v3432_v31 = vpop.eup %3431 }
 0x7fc   : > { %v2261_v37 = vmul.f32 %v3432_v31, %v3416_v49  ;;  %3275 = vmatprep.mubr.msk.bf16.mxu0 %vm1684_vm6, %v2264_v47  ;;  %v3056_v49 = vld [vmem:[%s4539_s10] ss:$0 sm:$0xff]  ;;  %v3298_v12 = vpop.f32.mrf.mxu1 }
 0x7fe   : > { %v2265_v22 = vpack.c.bf16 %v2261_v37, %v2260_v29  ;;  %v2503_v50 = vpop.f32.mrf.mxu1 }
 0x800   : > { %3276 = vmatmul.mubr.msk.bf16.gmra.mxu0 %vm1684_vm6, %v2265_v22 }
 0x8b8   : > { %v3273_v58 = vpop.f32.mrf.mxu0 }
 0x8ba   : > { %v2316_v19 = vpop.f32.mrf.mxu0 }
 0x8bc   : > { %v3274_v36 = vpop.f32.mrf.mxu0 }
 0x8bd   : > { %v2350_v6 = vpack.c.bf16 %v3274_v36, %v3273_v58 }
 0x8be   : > { %v2319_v23 = vpop.f32.mrf.mxu0 }
 0x8bf   : > { %v2349_v26 = vpack.c.bf16 %v2319_v23, %v2316_v19 }
 0x8c0   : > { %v3277_v27 = vpop.f32.mrf.mxu0 }
 0x8c1   : > { %3281 = vmatprep.mubr.msk.bf16.mxu0 %vm1594_vm5, %v2349_v26 }
 0x8c2   : > { %v2332_v59 = vpop.f32.mrf.mxu0  ;;  %3282 = vmatmul.mubr.msk.bf16.vlgmr.msra.gmra.mxu0 %vm1594_vm5, %v2350_v6 }
 0x8c4   : > { %v3278_v62 = vpop.f32.mrf.mxu0 }
 0x8c5   : > { %v2352_v34 = vpack.c.bf16 %v3278_v62, %v3277_v27 }
 0x8c6   : > { %v2335_v25 = vpop.f32.mrf.mxu0 }
 0x8c7   : > { %v2351_v3 = vpack.c.bf16 %v2335_v25, %v2332_v59 }
 0x8c9   : > { %3285 = vmatprep.mubr.msk.bf16.mxu0 %vm1594_vm5, %v2351_v3 }
 0x8ca   : > { %3286 = vmatmul.mubr.msk.bf16.gmra.mxu0 %vm1594_vm5, %v2352_v34 }
 0x982   : > { %v3283_v63 = vpop.f32.mrf.mxu0 }
 0x983   : > { %v2493_v61 = vadd.f32 %v3293_v42, %v3283_v63 }
 0x984   : > { %v2404_v4 = vpop.f32.mrf.mxu0 }
 0x985   : > { %v2485_v55 = vadd.f32 %v2484_v54, %v2404_v4  ;;  %v2517_v33 = vadd.f32 %v2493_v61, %v4075_v46 }
 0x986   : > { %v3284_v9 = vpop.f32.mrf.mxu0 }
 0x987   : > { %v2515_v1 = vadd.f32 %v2485_v55, %v4047_v32  ;;  %v2496_v10 = vadd.f32 %v3294_v52, %v3284_v9  ;;  %v4383_v39 = vadd.f32 %v3056_v49, %v2517_v33 }
 0x988   : > { %v2407_v41 = vpop.f32.mrf.mxu0 }
 0x989   : > { %v4381_v11 = vadd.f32 %v3056_v49, %v2515_v1  ;;  %v2488_v45 = vadd.f32 %v2487_v57, %v2407_v41  ;;  %v2518_v0 = vadd.f32 %v2496_v10, %v4082_v51  ;;  %v2544_v35 = vsel %vm1223_vm14, %v4383_v39, 0.0 }
 0x98a   : > { %v3287_v53 = vpop.f32.mrf.mxu0 }
 0x98b   : > { %v2516_v46 = vadd.f32 %v2488_v45, %v4065_v40  ;;  %v2509_v48 = vadd.f32 %v3297_v24, %v3287_v53  ;;  %v2538_v5 = vsel %vm1223_vm14, %v4381_v11, 0.0  ;;  %v4391_v15 = vadd.f32 %v3056_v49, %v2518_v0 }
 0x98c   : > { %2539 = vadd.xlane.f32.xlu0 %v2538_v5  ;;  %v2420_v32 = vpop.f32.mrf.mxu0 }
 0x98d   : > { %v4389_v21 = vadd.f32 %v3056_v49, %v2516_v46  ;;  %v2501_v7 = vadd.f32 %v2500_v16, %v2420_v32  ;;  %v2521_v51 = vadd.f32 %v2509_v48, %v4130_v28  ;;  %v2547_v43 = vsel %vm1223_vm14, %v4391_v15, 0.0 }
 0x98e   : > { %v3288_v17 = vpop.f32.mrf.mxu0 }
 0x98f   : > { %v2519_v40 = vadd.f32 %v2501_v7, %v4118_v14  ;;  %v2512_v56 = vadd.f32 %v3298_v12, %v3288_v17  ;;  %v2541_v38 = vsel %vm1223_vm14, %v4389_v21, 0.0  ;;  %v4403_v20 = vadd.f32 %v3056_v49, %v2521_v51  ;;  %v2672_v17 = vld [vmem:[%s4542_s13] sm:$0xff] }
 0x990   : > { %2545 = vadd.xlane.f32.xlu0 %v2544_v35  ;;  %2542 = vadd.xlane.f32.xlu1 %v2541_v38  ;;  %v2423_v2 = vpop.f32.mrf.mxu0  ;;  %v2677_v35 = vpack.c.bf16 %v2672_v17, %v2672_v17 }
 0x991   : > { %v4399_v30 = vadd.f32 %v3056_v49, %v2519_v40  ;;  %v2504_v18 = vadd.f32 %v2503_v50, %v2423_v2  ;;  %v2522_v28 = vadd.f32 %v2512_v56, %v4138_v13  ;;  %v2556_v29 = vsel %vm1223_vm14, %v4403_v20, 0.0 }
 0x992   : > { %3335 = vmatprep.subr.msk.bf16.mxu0 %vm1377_vm4, %v2677_v35  ;;  %v2698_v51 = vsel %vm1377_vm4, %v2677_v35, 0 }
 0x993   : > { %v2520_v14 = vadd.f32 %v2504_v18, %v4127_v44  ;;  %v2550_v60 = vsel %vm1223_vm14, %v4399_v30, 0.0  ;;  %v4411_v31 = vadd.f32 %v3056_v49, %v2522_v28  ;;  %3300 = vmatpush3.bf16.msra.mxu0 %v2698_v51 }
 0x994   : > { %2548 = vadd.xlane.f32.xlu1 %v2547_v43  ;;  %2551 = vadd.xlane.f32.xlu0 %v2550_v60 }
 0x995   : > { %v4409_v8 = vadd.f32 %v3056_v49, %v2520_v14  ;;  %v2559_v44 = vsel %vm1223_vm14, %v4411_v31, 0.0 }
 0x997   : > { %v2553_v47 = vsel %vm1223_vm14, %v4409_v8, 0.0 }
 0x998   : > { %2554 = vadd.xlane.f32.xlu1 %v2553_v47  ;;  %2557 = vadd.xlane.f32.xlu0 %v2556_v29 }
 0x99c   : > { %2560 = vadd.xlane.f32.xlu1 %v2559_v44 }
 0xa15   : > { %v2540_v13 = vpop.xlane.xlu0 %2539 }
 0xa16   : > { %v2562_v37 = vmul.f32 0.125, %v2540_v13 }
 0xa18   : > { %v4420_v22 = vsub.f32 %v4381_v11, %v2562_v37 }
 0xa19   : > { %v2546_v58 = vpop.xlane.xlu0 %2545  ;;  %v2543_v19 = vpop.xlane.xlu1 %2542 }
 0xa1a   : > { %v2564_v36 = vmul.f32 0.125, %v2546_v58  ;;  %v2563_v23 = vmul.f32 0.125, %v2543_v19  ;;  %v2578_v26 = vmul.f32 %v4420_v22, %v4420_v22 }
 0xa1c   : > { %v4425_v6 = vsub.f32 %v4383_v39, %v2564_v36  ;;  %v4428_v27 = vsub.f32 %v4389_v21, %v2563_v23  ;;  %v2586_v59 = vsel %vm1223_vm14, %v2578_v26, 0.0 }
 0xa1d   : > { %v2549_v62 = vpop.xlane.xlu1 %2548  ;;  %2587 = vadd.xlane.f32.xlu0 %v2586_v59  ;;  %v2552_v25 = vpop.xlane.xlu0 %2551 }
 0xa1e   : > { %v2565_v3 = vmul.f32 0.125, %v2549_v62  ;;  %v2566_v34 = vmul.f32 0.125, %v2552_v25  ;;  %v2579_v42 = vmul.f32 %v4428_v27, %v4428_v27  ;;  %v2580_v54 = vmul.f32 %v4425_v6, %v4425_v6 }
 0xa20   : > { %v4436_v52 = vsub.f32 %v4391_v15, %v2565_v3  ;;  %v4439_v57 = vsub.f32 %v4399_v30, %v2566_v34  ;;  %v2589_v63 = vsel %vm1223_vm14, %v2579_v42, 0.0  ;;  %v2592_v61 = vsel %vm1223_vm14, %v2580_v54, 0.0  ;;  %v3057_v54 = vld [vmem:[%s4540_s11] ss:$0 sm:$0xff] }
 0xa21   : > { %2590 = vadd.xlane.f32.xlu1 %v2589_v63  ;;  %v2555_v24 = vpop.xlane.xlu1 %2554  ;;  %2593 = vadd.xlane.f32.xlu0 %v2592_v61  ;;  %v2558_v4 = vpop.xlane.xlu0 %2557 }
 0xa22   : > { %v2567_v55 = vmul.f32 0.125, %v2555_v24  ;;  %v2568_v33 = vmul.f32 0.125, %v2558_v4  ;;  %v2581_v9 = vmul.f32 %v4436_v52, %v4436_v52  ;;  %v2582_v49 = vmul.f32 %v4439_v57, %v4439_v57 }
 0xa24   : > { %v4448_v1 = vsub.f32 %v4409_v8, %v2567_v55  ;;  %v4451_v10 = vsub.f32 %v4403_v20, %v2568_v33  ;;  %v2595_v16 = vsel %vm1223_vm14, %v2581_v9, 0.0  ;;  %v2598_v41 = vsel %vm1223_vm14, %v2582_v49, 0.0  ;;  %v3058_v33 = vld [vmem:[%s4541_s12] ss:$0 sm:$0xff] }
 0xa25   : > { %2596 = vadd.xlane.f32.xlu1 %v2595_v16  ;;  %v2561_v45 = vpop.xlane.xlu1 %2560  ;;  %2599 = vadd.xlane.f32.xlu0 %v2598_v41 }
 0xa26   : > { %v2569_v0 = vmul.f32 0.125, %v2561_v45  ;;  %v2583_v53 = vmul.f32 %v4448_v1, %v4448_v1  ;;  %v2584_v46 = vmul.f32 %v4451_v10, %v4451_v10 }
 0xa28   : > { %v4460_v48 = vsub.f32 %v4411_v31, %v2569_v0  ;;  %v2601_v5 = vsel %vm1223_vm14, %v2583_v53, 0.0  ;;  %v2604_v12 = vsel %vm1223_vm14, %v2584_v46, 0.0 }
 0xa29   : > { %2602 = vadd.xlane.f32.xlu1 %v2601_v5  ;;  %2605 = vadd.xlane.f32.xlu0 %v2604_v12 }
 0xa2a   : > { %v2585_v32 = vmul.f32 %v4460_v48, %v4460_v48 }
 0xa2c   : > { %v2607_v7 = vsel %vm1223_vm14, %v2585_v32, 0.0 }
 0xa2d   : > { %2608 = vadd.xlane.f32.xlu1 %v2607_v7 }
 0xaa6   : > { %v2588_v40 = vpop.xlane.xlu0 %2587 }
 0xaa7   : > { %v2610_v56 = vmul.f32 0.125, %v2588_v40 }
 0xaa9   : > { %v2618_v38 = vadd.f32 1e-05, %v2610_v56 }
 0xaaa   : > { %v2591_v50 = vpop.xlane.xlu1 %2590  ;;  %v2594_v2 = vpop.xlane.xlu0 %2593 }
 0xaab   : > { %3433 = vrsqrt.f32 %v2618_v38  ;;  %v2611_v18 = vmul.f32 0.125, %v2591_v50  ;;  %v2612_v43 = vmul.f32 0.125, %v2594_v2 }
 0xaad   : > { %v2619_v28 = vadd.f32 1e-05, %v2611_v18  ;;  %v2620_v14 = vadd.f32 1e-05, %v2612_v43 }
 0xaae   : > { %v2597_v60 = vpop.xlane.xlu1 %2596  ;;  %v2600_v47 = vpop.xlane.xlu0 %2599 }
 0xaaf   : > { %3435 = vrsqrt.f32 %v2619_v28  ;;  %v2613_v29 = vmul.f32 0.125, %v2597_v60  ;;  %v2614_v44 = vmul.f32 0.125, %v2600_v47 }
 0xab0   : > { %3437 = vrsqrt.f32 %v2620_v14 }
 0xab1   : > { %v2621_v13 = vadd.f32 1e-05, %v2613_v29  ;;  %v2622_v37 = vadd.f32 1e-05, %v2614_v44 }
 0xab2   : > { %v2603_v58 = vpop.xlane.xlu1 %2602  ;;  %v2606_v19 = vpop.xlane.xlu0 %2605 }
 0xab3   : > { %3439 = vrsqrt.f32 %v2621_v13  ;;  %v2615_v36 = vmul.f32 0.125, %v2603_v58  ;;  %v2616_v23 = vmul.f32 0.125, %v2606_v19 }
 0xab4   : > { %3441 = vrsqrt.f32 %v2622_v37 }
 0xab5   : > { %v2623_v26 = vadd.f32 1e-05, %v2615_v36  ;;  %v2624_v59 = vadd.f32 1e-05, %v2616_v23 }
 0xab6   : > { %v2609_v62 = vpop.xlane.xlu1 %2608 }
 0xab7   : > { %3443 = vrsqrt.f32 %v2623_v26  ;;  %v2617_v25 = vmul.f32 0.125, %v2609_v62 }
 0xab8   : > { %v3434_v3 = vpop.eup %3433  ;;  %3445 = vrsqrt.f32 %v2624_v59 }
 0xab9   : > { %v2625_v34 = vadd.f32 1e-05, %v2617_v25  ;;  %v2634_v42 = vmul.f32 %v3434_v3, %v4420_v22 }
 0xabb   : > { %3447 = vrsqrt.f32 %v2625_v34  ;;  %v2649_v4 = vmul.f32 %v3057_v54, %v2634_v42 }
 0xabc   : > { %v3436_v63 = vpop.eup %3435 }
 0xabd   : > { %v3438_v61 = vpop.eup %3437  ;;  %v2635_v24 = vmul.f32 %v3436_v63, %v4428_v27  ;;  %v2664_v45 = vadd.f32 %v3058_v33, %v2649_v4 }
 0xabe   : > { %v2636_v55 = vmul.f32 %v3438_v61, %v4425_v6 }
 0xabf   : > { %v2650_v9 = vmul.f32 %v3057_v54, %v2635_v24 }
 0xac0   : > { %v3440_v49 = vpop.eup %3439  ;;  %v2651_v22 = vmul.f32 %v3057_v54, %v2636_v55 }
 0xac1   : > { %v3442_v16 = vpop.eup %3441  ;;  %v2637_v41 = vmul.f32 %v3440_v49, %v4436_v52  ;;  %v2665_v0 = vadd.f32 %v3058_v33, %v2650_v9 }
 0xac2   : > { %v2638_v53 = vmul.f32 %v3442_v16, %v4439_v57  ;;  %v2666_v6 = vadd.f32 %v3058_v33, %v2651_v22 }
 0xac3   : > { %v2652_v46 = vmul.f32 %v3057_v54, %v2637_v41  ;;  %v2673_v5 = vpack.c.bf16 %v2665_v0, %v2664_v45 }
 0xac4   : > { %v3444_v27 = vpop.eup %3443  ;;  %v2653_v17 = vmul.f32 %v3057_v54, %v2638_v53 }
 0xac5   : > { %v3446_v12 = vpop.eup %3445  ;;  %3301 = vmatprep.mubr.msk.bf16.mxu0 %vm1223_vm14, %v2673_v5  ;;  %v2667_v32 = vadd.f32 %v3058_v33, %v2652_v46  ;;  %v2639_v7 = vmul.f32 %v3444_v27, %v4448_v1 }
 0xac6   : > { %v2640_v35 = vmul.f32 %v3446_v12, %v4451_v10  ;;  %v2668_v56 = vadd.f32 %v3058_v33, %v2653_v17  ;;  %v2805_v10 = vld [vmem:[%s4544_s15] sm:$0xff] }
 0xac7   : > { %v2674_v51 = vpack.c.bf16 %v2667_v32, %v2666_v6  ;;  %v2654_v40 = vmul.f32 %v3057_v54, %v2639_v7  ;;  %v2810_v14 = vpack.c.bf16 %v2805_v10, %v2805_v10 }
 0xac8   : > { %v3448_v52 = vpop.eup %3447  ;;  %v2655_v50 = vmul.f32 %v3057_v54, %v2640_v35 }
 0xac9   : > { %3302 = vmatmul.mubr.msk.bf16.vlgmr.msra.gmra.mxu0 %vm1223_vm14, %v2674_v51  ;;  %v2669_v57 = vadd.f32 %v3058_v33, %v2654_v40  ;;  %v2641_v38 = vmul.f32 %v3448_v52, %v4460_v48  ;;  %3336 = vmatprep.subr.msk.bf16.mxu1 %vm1377_vm4, %v2810_v14  ;;  %v2824_v60 = vsel %vm1377_vm4, %v2810_v14, 0  ;;  %v3059_v48 = vld [vmem:[%s4543_s14] ss:$0 sm:$0xff] }
 0xaca   : > { %v2670_v43 = vadd.f32 %v3058_v33, %v2655_v50  ;;  %3310 = vmatpush3.bf16.msra.mxu1 %v2824_v60 }
 0xacb   : > { %v2675_v2 = vpack.c.bf16 %v2669_v57, %v2668_v56  ;;  %v2656_v18 = vmul.f32 %v3057_v54, %v2641_v38 }
 0xacd   : > { %3305 = vmatprep.mubr.msk.bf16.mxu0 %vm1223_vm14, %v2675_v2  ;;  %v2671_v28 = vadd.f32 %v3058_v33, %v2656_v18 }
 0xacf   : > { %v2676_v1 = vpack.c.bf16 %v2671_v28, %v2670_v43 }
 0xad1   : > { %3306 = vmatmul.mubr.msk.bf16.gmra.mxu0 %vm1223_vm14, %v2676_v1 }
 0xb89   : > { %v3303_v47 = vpop.f32.mrf.mxu0 }
 0xb8a   : > { %v2743_v29 = vadd.f32 %v3303_v47, %v3059_v48 }
 0xb8b   : > { %v2734_v44 = vpop.f32.mrf.mxu0 }
 0xb8c   : > { %v2735_v13 = vadd.f32 %v3059_v48, %v2734_v44  ;;  %v2775_v37 = vmul.f32 0.70710677, %v2743_v29  ;;  %v2767_v6 = vmul.f32 0.5, %v2743_v29 }
 0xb8d   : > { %v3304_v58 = vpop.f32.mrf.mxu0 }
 0xb8e   : > { %v2773_v19 = vmul.f32 0.70710677, %v2735_v13  ;;  %v2746_v36 = vadd.f32 %v3304_v58, %v3059_v48  ;;  %v2765_v5 = vmul.f32 0.5, %v2735_v13  ;;  %v3068_v58 = vld [vmem:[%s4545_s16] ss:$0 sm:$0xff] }
 0xb8f   : > { %v2737_v23 = vpop.f32.mrf.mxu0 }
 0xb90   : > { %3449 = verf.f32 %v2773_v19  ;;  %v2776_v26 = vmul.f32 0.70710677, %v2746_v36  ;;  %v2738_v59 = vadd.f32 %v3059_v48, %v2737_v23  ;;  %v2768_v46 = vmul.f32 0.5, %v2746_v36 }
 0xb91   : > { %3451 = verf.f32 %v2775_v37  ;;  %v3307_v62 = vpop.f32.mrf.mxu0 }
 0xb92   : > { %3453 = verf.f32 %v2776_v26  ;;  %v2774_v25 = vmul.f32 0.70710677, %v2738_v59  ;;  %v2759_v3 = vadd.f32 %v3307_v62, %v3059_v48  ;;  %v2766_v27 = vmul.f32 0.5, %v2738_v59 }
 0xb93   : > { %v2750_v34 = vpop.f32.mrf.mxu0 }
 0xb94   : > { %3455 = verf.f32 %v2774_v25  ;;  %v2751_v42 = vadd.f32 %v3059_v48, %v2750_v34  ;;  %v2779_v54 = vmul.f32 0.70710677, %v2759_v3  ;;  %v2771_v14 = vmul.f32 0.5, %v2759_v3 }
 0xb95   : > { %v3308_v63 = vpop.f32.mrf.mxu0 }
 0xb96   : > { %v2777_v61 = vmul.f32 0.70710677, %v2751_v42  ;;  %v2762_v24 = vadd.f32 %v3308_v63, %v3059_v48  ;;  %v2769_v28 = vmul.f32 0.5, %v2751_v42 }
 0xb97   : > { %v2753_v4 = vpop.f32.mrf.mxu0 }
 0xb98   : > { %3457 = verf.f32 %v2777_v61  ;;  %v2780_v55 = vmul.f32 0.70710677, %v2762_v24  ;;  %v2754_v33 = vadd.f32 %v3059_v48, %v2753_v4  ;;  %v2772_v43 = vmul.f32 0.5, %v2762_v24 }
 0xb99   : > { %3459 = verf.f32 %v2779_v54 }
 0xb9a   : > { %3461 = verf.f32 %v2780_v55  ;;  %v2778_v9 = vmul.f32 0.70710677, %v2754_v33  ;;  %v2770_v1 = vmul.f32 0.5, %v2754_v33 }
 0xb9c   : > { %3463 = verf.f32 %v2778_v9 }
 0xb9d   : > { %v3450_v49 = vpop.eup %3449 }
 0xb9e   : > { %v3452_v16 = vpop.eup %3451  ;;  %v2789_v41 = vadd.f32 1.0, %v3450_v49 }
 0xb9f   : > { %v3454_v22 = vpop.eup %3453  ;;  %v2791_v53 = vadd.f32 1.0, %v3452_v16 }
 0xba0   : > { %v2792_v45 = vadd.f32 1.0, %v3454_v22  ;;  %v2797_v7 = vmul.f32 %v2789_v41, %v2765_v5 }
 0xba1   : > { %v3456_v0 = vpop.eup %3455  ;;  %v2799_v51 = vmul.f32 %v2791_v53, %v2767_v6 }
 0xba2   : > { %v2790_v12 = vadd.f32 1.0, %v3456_v0  ;;  %v2800_v32 = vmul.f32 %v2792_v45, %v2768_v46 }
 0xba4   : > { %v2798_v17 = vmul.f32 %v2790_v12, %v2766_v27  ;;  %v2807_v57 = vpack.c.bf16 %v2800_v32, %v2799_v51 }
 0xba5   : > { %v3458_v35 = vpop.eup %3457 }
 0xba6   : > { %v3460_v40 = vpop.eup %3459  ;;  %v2806_v52 = vpack.c.bf16 %v2798_v17, %v2797_v7  ;;  %v2793_v38 = vadd.f32 1.0, %v3458_v35 }
 0xba7   : > { %v3462_v56 = vpop.eup %3461  ;;  %v2795_v18 = vadd.f32 1.0, %v3460_v40 }
 0xba8   : > { %v2796_v50 = vadd.f32 1.0, %v3462_v56  ;;  %3311 = vmatprep.mubr.msk.bf16.mxu1 %vm1223_vm14, %v2806_v52  ;;  %v2801_v48 = vmul.f32 %v2793_v38, %v2769_v28 }
 0xba9   : > { %v3464_v2 = vpop.eup %3463  ;;  %3312 = vmatmul.mubr.msk.bf16.vlgmr.msra.gmra.mxu1 %vm1223_vm14, %v2807_v57  ;;  %v2803_v29 = vmul.f32 %v2795_v18, %v2771_v14 }
 0xbaa   : > { %v2794_v10 = vadd.f32 1.0, %v3464_v2  ;;  %v2804_v60 = vmul.f32 %v2796_v50, %v2772_v43 }
 0xbac   : > { %v2802_v47 = vmul.f32 %v2794_v10, %v2770_v1  ;;  %v2809_v13 = vpack.c.bf16 %v2804_v60, %v2803_v29 }
 0xbae   : > { %v2808_v44 = vpack.c.bf16 %v2802_v47, %v2801_v48 }
 0xbb0   : > { %3315 = vmatprep.mubr.msk.bf16.mxu1 %vm1223_vm14, %v2808_v44 }
 0xbb1   : > { %3316 = vmatmul.mubr.msk.bf16.gmra.mxu1 %vm1223_vm14, %v2809_v13 }
 0xc69   : > { %v3313_v37 = vpop.f32.mrf.mxu1 }
 0xc6a   : > { %v2893_v19 = vadd.f32 %v3313_v37, %v4383_v39 }
 0xc6b   : > { %v2860_v36 = vpop.f32.mrf.mxu1 }
 0xc6c   : > { %v2908_v23 = vadd.f32 %v3068_v58, %v2893_v19  ;;  %v2891_v26 = vadd.f32 %v2860_v36, %v4381_v11 }
 0xc6d   : > { %v3314_v59 = vpop.f32.mrf.mxu1 }
 0xc6e   : > { %2916 = vst.msk [vmem:[%s548_s22 + $0x10] sm:$0xff] %vm1223_vm14, %v2908_v23  ;;  %v2906_v62 = vadd.f32 %v3068_v58, %v2891_v26  ;;  %v2894_v25 = vadd.f32 %v3314_v59, %v4391_v15 }
 0xc6f   : > { %v2863_v3 = vpop.f32.mrf.mxu1 }
 0xc70   : > { %2914 = vst.msk [vmem:[%s548_s22] sm:$0xff] %vm1223_vm14, %v2906_v62  ;;  %v2909_v34 = vadd.f32 %v3068_v58, %v2894_v25  ;;  %v2892_v39 = vadd.f32 %v2863_v3, %v4389_v21 }
 0xc71   : > { %v3317_v42 = vpop.f32.mrf.mxu1 }
 0xc72   : > { %2917 = vst.msk [vmem:[%s548_s22 + $0x18] sm:$0xff] %vm1223_vm14, %v2909_v34  ;;  %v2907_v54 = vadd.f32 %v3068_v58, %v2892_v39  ;;  %v2897_v63 = vadd.f32 %v3317_v42, %v4403_v20 }
 0xc73   : > { %v2876_v61 = vpop.f32.mrf.mxu1 }
 0xc74   : > { %2915 = vst.msk [vmem:[%s548_s22 + $0x8] sm:$0xff] %vm1223_vm14, %v2907_v54  ;;  %v2912_v11 = vadd.f32 %v3068_v58, %v2897_v63  ;;  %v2895_v24 = vadd.f32 %v2876_v61, %v4399_v30 }
 0xc75   : > { %v3318_v4 = vpop.f32.mrf.mxu1 }
 0xc76   : > { %2920 = vst.msk [vmem:[%s548_s22 + $0x30] sm:$0xff] %vm1223_vm14, %v2912_v11  ;;  %v2910_v15 = vadd.f32 %v3068_v58, %v2895_v24  ;;  %v2898_v55 = vadd.f32 %v3318_v4, %v4411_v31 }
 0xc77   : > { %v2879_v33 = vpop.f32.mrf.mxu1 }
 0xc78   : > { %2918 = vst.msk [vmem:[%s548_s22 + $0x20] sm:$0xff] %vm1223_vm14, %v2910_v15  ;;  %v2913_v21 = vadd.f32 %v3068_v58, %v2898_v55  ;;  %v2896_v9 = vadd.f32 %v2879_v33, %v4409_v8 }
 0xc7a   : > { %2921 = vst.msk [vmem:[%s548_s22 + $0x38] sm:$0xff] %vm1223_vm14, %v2913_v21  ;;  %v2911_v20 = vadd.f32 %v3068_v58, %v2896_v9 }
 0xc7c   : > { %2919 = vst.msk [vmem:[%s548_s22 + $0x28] sm:$0xff] %vm1223_vm14, %v2911_v20 }
 0xc7d PF: > { %s27_s24 = sadd.s32 1, %s3471_s24  }
 0xc7e   : > { %p24_p4 = scmp.ge.s32.totalorder %s27_s24, 4  }
 0xc80   :  { %26 = sbr.rel (!%p24_p4) target bundleno = 3 (0x3), region = 124 }

</bundles_post_ra>
